<compile_context>
chip_gen: v6e
topology: v6e:2x2x1
jax: 0.10.0
libtpu: 0.0.40
codegen_flags: <defaults>
</compile_context>

<pallas_src>
import functools

import jax
import jax.numpy as jnp
from jax import lax
from jax.experimental import pallas as pl
from jax.experimental.pallas import tpu as pltpu

LANE = 128
SUBLANE = 8


def _round_up(x, m):
    return (x + m - 1) // m * m


# ----------------------------------------------------------------------------
# Fused kernel: num_layers LSTM layers + dense head, one batch tile per step.
# ----------------------------------------------------------------------------
def fused_lstm_dense_kernel(num_layers, hidden_size, seq_len, tile_b,
                            x_ref, h0_ref, c0_ref, *rest):
    """Per grid step (leading batch-tile dim squeezed by BlockSpec):
      x_ref   : (T*TB, D0)  f32   rows ordered time-major: row = t*TB + b
      h0_ref  : (L, TB, H)  f32
      c0_ref  : (L, TB, H)  f32
      w_ih[l] : (D_l, Gp)   bf16  gate-packed [i|f|g|o], Gp = round_up(4H, 128)
      w_hh[l] : (H, Gp)     bf16
      bias[l] : (1, Gp)     f32   b_ih + b_hh
      w_d     : (H, Ap)     bf16
      b_d     : (1, Ap)     f32
      out_ref : (T*TB, Ap)  f32
      gx_scr  : (T*TB, Gp)  f32   hoisted input-projection gates
      seq_scr : (T*TB, H)   f32   current layer's hidden sequence
    """
    L, H, T, TB = num_layers, hidden_size, seq_len, tile_b
    w_ih = rest[0:L]
    w_hh = rest[L:2 * L]
    bias = rest[2 * L:3 * L]
    wd_ref = rest[3 * L]
    bd_ref = rest[3 * L + 1]
    out_ref = rest[3 * L + 2]
    gx_scr = rest[3 * L + 3]
    seq_scr = rest[3 * L + 4]

    for l in range(L):
        # ---- hoisted input projection: one big MXU matmul per layer ----
        # (Layer 0 has K = input_size; that weight push happens once per call,
        #  outside the serial recurrence, so it is off the critical path.)
        if l == 0:
            inp = x_ref[...].astype(jnp.bfloat16)
        else:
            inp = seq_scr[...].astype(jnp.bfloat16)
        gx_scr[...] = (jnp.dot(inp, w_ih[l][...],
                               preferred_element_type=jnp.float32)
                       + bias[l][...])

        whh = w_hh[l][...]                     # (H, Gp) bf16, stays resident
        h0 = h0_ref[l].astype(jnp.bfloat16)    # (TB, H) matmul-operand dtype
        c0 = c0_ref[l]                         # (TB, H) f32

        def step(t, carry, whh=whh):
            h_bf, c = carry
            row = pl.multiple_of(t * TB, TB)
            gates = gx_scr[pl.ds(row, TB), :] + jnp.dot(
                h_bf, whh, preferred_element_type=jnp.float32)   # (TB, Gp) f32
            # 2 EUP pushes cover all 4 packed gates:
            #   sigmoid(x) = 0.5 * (tanh(0.5 x) + 1)
            sig = 0.5 * (jnp.tanh(0.5 * gates) + 1.0)
            th = jnp.tanh(gates)
            i_g = sig[:, 0 * H:1 * H]
            f_g = sig[:, 1 * H:2 * H]
            g_g = th[:, 2 * H:3 * H]
            o_g = sig[:, 3 * H:4 * H]
            c_new = f_g * c + i_g * g_g            # f32 elementwise (v5e-safe)
            h_new = o_g * jnp.tanh(c_new)
            seq_scr[pl.ds(row, TB), :] = h_new
            return (h_new.astype(jnp.bfloat16), c_new)

        # Short fixed T fully unrolls (LLO overlap); large T stays bounded to
        # avoid vreg-pressure / code-size blowup.
        lax.fori_loop(0, T, step, (h0, c0), unroll=min(T, 8))

    # ---- fused dense head on the whole (T*TB, H) slab ----
    y = jnp.dot(seq_scr[...].astype(jnp.bfloat16), wd_ref[...],
                preferred_element_type=jnp.float32) + bd_ref[...]
    out_ref[...] = y


# ----------------------------------------------------------------------------
# Parameter packing (PyTorch layout -> kernel layout) and init
# ----------------------------------------------------------------------------
def _pack_rnn_weight(w, gp):
    """(4H, d_in) PyTorch [i;f;g;o] -> (d_in, Gp) gate-packed, zero-padded, bf16."""
    d_in = w.shape[1]
    out = jnp.zeros((d_in, gp), jnp.float32).at[:, :w.shape[0]].set(w.T)
    return out.astype(jnp.bfloat16)


def _pack_rnn_bias(b, gp):
    """(4H,) -> (1, Gp) gate-packed, zero-padded, f32."""
    return jnp.zeros((1, gp), jnp.float32).at[0, :b.shape[0]].set(b)


def init_params(key, input_size, hidden_size, num_layers, n_actions):
    """PyTorch-style U(-1/sqrt(H), 1/sqrt(H)) init; returns (packed, raw)."""
    H = hidden_size
    Gp = _round_up(4 * H, LANE)
    Ap = _round_up(n_actions, LANE)
    bound = float(1.0 / (hidden_size ** 0.5))

    params = {"w_ih": [], "w_hh": [], "bias": []}
    raw = {"w_ih": [], "w_hh": [], "b_ih": [], "b_hh": []}
    for layer in range(num_layers):
        d_in = input_size if layer == 0 else hidden_size
        key, k1, k2, k3, k4 = jax.random.split(key, 5)
        w_ih = jax.random.uniform(k1, (4 * H, d_in), jnp.float32, -bound, bound)
        w_hh = jax.random.uniform(k2, (4 * H, H), jnp.float32, -bound, bound)
        b_ih = jax.random.uniform(k3, (4 * H,), jnp.float32, -bound, bound)
        b_hh = jax.random.uniform(k4, (4 * H,), jnp.float32, -bound, bound)
        params["w_ih"].append(_pack_rnn_weight(w_ih, Gp))
        params["w_hh"].append(_pack_rnn_weight(w_hh, Gp))
        params["bias"].append(_pack_rnn_bias(b_ih + b_hh, Gp))
        raw["w_ih"].append(w_ih); raw["w_hh"].append(w_hh)
        raw["b_ih"].append(b_ih); raw["b_hh"].append(b_hh)

    key, k5, k6 = jax.random.split(key, 3)
    w_d = jax.random.uniform(k5, (n_actions, H), jnp.float32, -bound, bound)
    b_d = jax.random.uniform(k6, (n_actions,), jnp.float32, -bound, bound)
    params["w_d"] = jnp.zeros((H, Ap), jnp.float32).at[:, :n_actions].set(
        w_d.T).astype(jnp.bfloat16)
    params["b_d"] = jnp.zeros((1, Ap), jnp.float32).at[0, :n_actions].set(b_d)
    raw["w_d"] = w_d
    raw["b_d"] = b_d
    return params, raw


# ----------------------------------------------------------------------------
# Forward pass (equivalent of Network.forward(input, h0, c0))
# ----------------------------------------------------------------------------
@functools.partial(jax.jit, static_argnames=("n_actions",))
def network_forward(params, x, h0, c0, *, n_actions):
    """x: (B, T, input_size) batch_first; h0/c0: (L, B, H). Returns (B, T, n_actions)."""
    B, T, D0 = x.shape
    L = len(params["w_ih"])
    H = h0.shape[-1]
    Gp = params["w_hh"][0].shape[1]
    Ap = params["w_d"].shape[1]

    TB = min(_round_up(B, SUBLANE), 128)      # rows per batch tile (grid axis)
    Bp = _round_up(B, TB)
    nbt = Bp // TB
    f32 = jnp.float32

    # Tiny wrapper-side relayouts only (the (T,B,H) activations never leave VMEM).
    # x: (B,T,D) -> (nbt, T*TB, D) with per-tile rows ordered row = t*TB + b.
    x_p = jnp.pad(x.astype(f32), ((0, Bp - B), (0, 0), (0, 0)))
    x_p = jnp.transpose(x_p, (1, 0, 2)).reshape(T, nbt, TB, D0)
    x_p = jnp.transpose(x_p, (1, 0, 2, 3)).reshape(nbt, T * TB, D0)

    def tile_state(s):                         # (L,B,H) -> (nbt, L, TB, H)
        s = jnp.pad(s.astype(f32), ((0, 0), (0, Bp - B), (0, 0)))
        return jnp.transpose(s.reshape(L, nbt, TB, H), (1, 0, 2, 3))

    h0_p = tile_state(h0)
    c0_p = tile_state(c0)

    kernel = functools.partial(fused_lstm_dense_kernel, L, H, T, TB)

    def full_spec(shape):                      # whole array, resident across grid
        return pl.BlockSpec(shape, lambda b, _n=len(shape): (0,) * _n)

    in_specs = (
        [pl.BlockSpec((None, T * TB, D0), lambda b: (b, 0, 0)),
         pl.BlockSpec((None, L, TB, H), lambda b: (b, 0, 0, 0)),
         pl.BlockSpec((None, L, TB, H), lambda b: (b, 0, 0, 0))]
        + [full_spec(w.shape) for w in params["w_ih"]]
        + [full_spec(w.shape) for w in params["w_hh"]]
        + [full_spec(bb.shape) for bb in params["bias"]]
        + [full_spec(params["w_d"].shape), full_spec(params["b_d"].shape)]
    )
    out_specs = pl.BlockSpec((None, T * TB, Ap), lambda b: (b, 0, 0))

    out = pl.pallas_call(
        kernel,
        grid=(nbt,),
        out_shape=jax.ShapeDtypeStruct((nbt, T * TB, Ap), f32),
        in_specs=in_specs,
        out_specs=out_specs,
        scratch_shapes=[
            pltpu.VMEM((T * TB, Gp), f32),     # hoisted gate projections
            pltpu.VMEM((T * TB, H), f32),      # per-layer hidden sequence
        ],
        compiler_params=pltpu.CompilerParams(
            dimension_semantics=("parallel",),     # batch tiles -> v7x megacore
            vmem_limit_bytes=48 * 1024 * 1024),    # sized for v7x's 64 MiB VMEM
    )(x_p, h0_p, c0_p,
      *params["w_ih"], *params["w_hh"], *params["bias"],
      params["w_d"], params["b_d"])

    # (nbt, T*TB, Ap) -> (B, T, n_actions)
    out = out.reshape(nbt, T, TB, Ap)
    out = jnp.transpose(out, (0, 2, 1, 3)).reshape(Bp, T, Ap)
    return out[:B, :, :n_actions]


# ----------------------------------------------------------------------------
# Pure-JAX f32 reference (mirrors nn.LSTM + nn.Linear) for a sanity check.
# ----------------------------------------------------------------------------
def reference_forward(raw, x, h0, c0):
    L = len(raw["w_ih"])
    H = h0.shape[-1]
    h = [h0[l] for l in range(L)]
    c = [c0[l] for l in range(L)]
    B, T, _ = x.shape
    outs = []
    for t in range(T):
        inp = x[:, t, :]
        for l in range(L):
            gates = (inp @ raw["w_ih"][l].T + raw["b_ih"][l]
                     + h[l] @ raw["w_hh"][l].T + raw["b_hh"][l])
            i = jax.nn.sigmoid(gates[:, 0 * H:1 * H])
            f = jax.nn.sigmoid(gates[:, 1 * H:2 * H])
            g = jnp.tanh(gates[:, 2 * H:3 * H])
            o = jax.nn.sigmoid(gates[:, 3 * H:4 * H])
            c[l] = f * c[l] + i * g
            h[l] = o * jnp.tanh(c[l])
            inp = h[l]
        outs.append(inp)
    seq = jnp.stack(outs, axis=1)                       # (B, T, H)
    return seq @ raw["w_d"].T + raw["b_d"]


# ----------------------------------------------------------------------------
if __name__ == "__main__":
    batch = 2
    seq = 8
    input_size = 4
    hidden_size = 32
    num_layers = 2
    n_actions = 4

    key = jax.random.PRNGKey(0)
    kp, kx, kh, kc = jax.random.split(key, 4)

    params, raw = init_params(kp, input_size, hidden_size, num_layers, n_actions)

    x = jax.random.normal(kx, (batch, seq, input_size), jnp.float32)
    h0 = jax.random.normal(kh, (num_layers, batch, hidden_size), jnp.float32)
    c0 = jax.random.normal(kc, (num_layers, batch, hidden_size), jnp.float32)

    out = network_forward(params, x, h0, c0, n_actions=n_actions)
    out = jax.block_until_ready(out)
    assert out.shape == (batch, seq, n_actions), out.shape

    # bf16 matmul operands (f32 accumulate) => small deviation vs the f32 reference.
    ref = reference_forward(raw, x, h0, c0)
    err = float(jnp.max(jnp.abs(out - ref)))
    assert err < 1e-1, f"max |kernel - reference| = {err}"
    print("KERNEL_OK")
</pallas_src>

<mosaic_0001>
module attributes {stable_mosaic.version = 11 : i64} {
  func.func @fused_lstm_dense_kernel(%arg0: i32, %arg1: memref<1x64x4xf32, #tpu.memory_space<vmem>>, %arg2: memref<1x2x8x32xf32, #tpu.memory_space<vmem>>, %arg3: memref<1x2x8x32xf32, #tpu.memory_space<vmem>>, %arg4: memref<4x128xbf16, #tpu.memory_space<vmem>>, %arg5: memref<32x128xbf16, #tpu.memory_space<vmem>>, %arg6: memref<32x128xbf16, #tpu.memory_space<vmem>>, %arg7: memref<32x128xbf16, #tpu.memory_space<vmem>>, %arg8: memref<1x128xf32, #tpu.memory_space<vmem>>, %arg9: memref<1x128xf32, #tpu.memory_space<vmem>>, %arg10: memref<32x128xbf16, #tpu.memory_space<vmem>>, %arg11: memref<1x128xf32, #tpu.memory_space<vmem>>, %arg12: memref<1x64x128xf32, #tpu.memory_space<vmem>>, %arg13: memref<64x128xf32, #tpu.memory_space<vmem>>, %arg14: memref<64x32xf32, #tpu.memory_space<vmem>>) attributes {dimension_semantics = [#tpu.dimension_semantics<parallel>], iteration_bounds = array<i64: 1>, scalar_prefetch = 0 : i64, scratch_operands = 2 : i64, tpu.core_type = #tpu.core_type<tc>, window_params = [{transform_indices = @transform_0, window_bounds = array<i64: 1, 64, 4>}, {transform_indices = @transform_1, window_bounds = array<i64: 1, 2, 8, 32>}, {transform_indices = @transform_2, window_bounds = array<i64: 1, 2, 8, 32>}, {pipeline_mode = #tpu.pipeline_mode<synchronous>, transform_indices = @transform_3, window_bounds = array<i64: 4, 128>}, {pipeline_mode = #tpu.pipeline_mode<synchronous>, transform_indices = @transform_4, window_bounds = array<i64: 32, 128>}, {pipeline_mode = #tpu.pipeline_mode<synchronous>, transform_indices = @transform_5, window_bounds = array<i64: 32, 128>}, {pipeline_mode = #tpu.pipeline_mode<synchronous>, transform_indices = @transform_6, window_bounds = array<i64: 32, 128>}, {pipeline_mode = #tpu.pipeline_mode<synchronous>, transform_indices = @transform_7, window_bounds = array<i64: 1, 128>}, {pipeline_mode = #tpu.pipeline_mode<synchronous>, transform_indices = @transform_8, window_bounds = array<i64: 1, 128>}, {pipeline_mode = #tpu.pipeline_mode<synchronous>, transform_indices = @transform_9, window_bounds = array<i64: 32, 128>}, {pipeline_mode = #tpu.pipeline_mode<synchronous>, transform_indices = @transform_10, window_bounds = array<i64: 1, 128>}, {transform_indices = @transform_11, window_bounds = array<i64: 1, 64, 128>}]} {
    %c0 = arith.constant 0 : index
    %c0_0 = arith.constant 0 : index
    %c0_1 = arith.constant 0 : index
    %0 = vector.load %arg1[%c0, %c0_0, %c0_1] : memref<1x64x4xf32, #tpu.memory_space<vmem>>, vector<1x64x4xf32>
    %1 = vector.shape_cast %0 : vector<1x64x4xf32> to vector<64x4xf32>
    %2 = arith.truncf %1 : vector<64x4xf32> to vector<64x4xbf16>
    %c0_2 = arith.constant 0 : index
    %c0_3 = arith.constant 0 : index
    %3 = vector.load %arg4[%c0_2, %c0_3] : memref<4x128xbf16, #tpu.memory_space<vmem>>, vector<4x128xbf16>
    %cst = arith.constant dense<0.000000e+00> : vector<64x128xf32>
    %4 = tpu.matmul %2, %3, %cst {dimension_numbers = #tpu.dot_dimension_numbers<[1], [0], [0], [1], [0, 0, 1, 1], [], []>} : vector<64x4xbf16>, vector<4x128xbf16>, vector<64x128xf32> -> vector<64x128xf32>
    %c0_4 = arith.constant 0 : index
    %c0_5 = arith.constant 0 : index
    %5 = vector.load %arg8[%c0_4, %c0_5] : memref<1x128xf32, #tpu.memory_space<vmem>>, vector<1x128xf32>
    %6 = vector.broadcast %5 : vector<1x128xf32> to vector<64x128xf32>
    %7 = arith.addf %4, %6 : vector<64x128xf32>
    %c0_6 = arith.constant 0 : index
    %c0_7 = arith.constant 0 : index
    %8 = vector.load %arg13[%c0_6, %c0_7] : memref<64x128xf32, #tpu.memory_space<vmem>>, vector<64x128xf32>
    tpu.vector_store %arg13[%c0_6, %c0_7], %7 {strides = array<i32>} : memref<64x128xf32, #tpu.memory_space<vmem>>, vector<64x128xf32>,
    %c0_8 = arith.constant 0 : index
    %c0_9 = arith.constant 0 : index
    %9 = vector.load %arg6[%c0_8, %c0_9] : memref<32x128xbf16, #tpu.memory_space<vmem>>, vector<32x128xbf16>
    %c0_10 = arith.constant 0 : index
    %c0_11 = arith.constant 0 : index
    %c0_12 = arith.constant 0 : index
    %c0_13 = arith.constant 0 : index
    %10 = vector.load %arg2[%c0_10, %c0_11, %c0_12, %c0_13] : memref<1x2x8x32xf32, #tpu.memory_space<vmem>>, vector<1x1x8x32xf32>
    %11 = vector.shape_cast %10 : vector<1x1x8x32xf32> to vector<8x32xf32>
    %12 = arith.truncf %11 : vector<8x32xf32> to vector<8x32xbf16>
    %c0_14 = arith.constant 0 : index
    %c0_15 = arith.constant 0 : index
    %c0_16 = arith.constant 0 : index
    %c0_17 = arith.constant 0 : index
    %13 = vector.load %arg3[%c0_14, %c0_15, %c0_16, %c0_17] : memref<1x2x8x32xf32, #tpu.memory_space<vmem>>, vector<1x1x8x32xf32>
    %14 = vector.shape_cast %13 : vector<1x1x8x32xf32> to vector<8x32xf32>
    %c0_i32 = arith.constant 0 : i32
    %c8_i32 = arith.constant 8 : i32
    %15 = arith.muli %c0_i32, %c8_i32 : i32
    %16 = tpu.assume_multiple %15, 8 : i32
    %17 = arith.index_cast %16 : i32 to index
    %c0_18 = arith.constant 0 : index
    %18 = vector.load %arg13[%17, %c0_18] : memref<64x128xf32, #tpu.memory_space<vmem>>, vector<8x128xf32>
    %cst_19 = arith.constant dense<0.000000e+00> : vector<8x128xf32>
    %19 = tpu.matmul %12, %9, %cst_19 {dimension_numbers = #tpu.dot_dimension_numbers<[1], [0], [0], [1], [0, 0, 1, 1], [], []>} : vector<8x32xbf16>, vector<32x128xbf16>, vector<8x128xf32> -> vector<8x128xf32>
    %20 = arith.addf %18, %19 : vector<8x128xf32>
    %cst_20 = arith.constant 5.000000e-01 : f32
    %21 = vector.broadcast %cst_20 : f32 to vector<8x128xf32>
    %22 = arith.mulf %21, %20 : vector<8x128xf32>
    %23 = math.tanh %22 : vector<8x128xf32>
    %cst_21 = arith.constant 1.000000e+00 : f32
    %24 = vector.broadcast %cst_21 : f32 to vector<8x128xf32>
    %25 = arith.addf %23, %24 : vector<8x128xf32>
    %cst_22 = arith.constant 5.000000e-01 : f32
    %26 = vector.broadcast %cst_22 : f32 to vector<8x128xf32>
    %27 = arith.mulf %26, %25 : vector<8x128xf32>
    %28 = math.tanh %20 : vector<8x128xf32>
    %29 = vector.extract_strided_slice %27 {offsets = [0, 0], sizes = [8, 32], strides = [1, 1]} : vector<8x128xf32> to vector<8x32xf32>
    %30 = vector.extract_strided_slice %27 {offsets = [0, 32], sizes = [8, 32], strides = [1, 1]} : vector<8x128xf32> to vector<8x32xf32>
    %31 = vector.extract_strided_slice %28 {offsets = [0, 64], sizes = [8, 32], strides = [1, 1]} : vector<8x128xf32> to vector<8x32xf32>
    %32 = vector.extract_strided_slice %27 {offsets = [0, 96], sizes = [8, 32], strides = [1, 1]} : vector<8x128xf32> to vector<8x32xf32>
    %33 = arith.mulf %30, %14 : vector<8x32xf32>
    %34 = arith.mulf %29, %31 : vector<8x32xf32>
    %35 = arith.addf %33, %34 : vector<8x32xf32>
    %36 = math.tanh %35 : vector<8x32xf32>
    %37 = arith.mulf %32, %36 : vector<8x32xf32>
    %38 = arith.index_cast %16 : i32 to index
    %c0_23 = arith.constant 0 : index
    %39 = vector.load %arg14[%38, %c0_23] : memref<64x32xf32, #tpu.memory_space<vmem>>, vector<8x32xf32>
    tpu.vector_store %arg14[%38, %c0_23], %37 {strides = array<i32>} : memref<64x32xf32, #tpu.memory_space<vmem>>, vector<8x32xf32>,
    %40 = arith.truncf %37 : vector<8x32xf32> to vector<8x32xbf16>
    %c1_i32 = arith.constant 1 : i32
    %c8_i32_24 = arith.constant 8 : i32
    %41 = arith.muli %c1_i32, %c8_i32_24 : i32
    %42 = tpu.assume_multiple %41, 8 : i32
    %43 = arith.index_cast %42 : i32 to index
    %c0_25 = arith.constant 0 : index
    %44 = vector.load %arg13[%43, %c0_25] : memref<64x128xf32, #tpu.memory_space<vmem>>, vector<8x128xf32>
    %cst_26 = arith.constant dense<0.000000e+00> : vector<8x128xf32>
    %45 = tpu.matmul %40, %9, %cst_26 {dimension_numbers = #tpu.dot_dimension_numbers<[1], [0], [0], [1], [0, 0, 1, 1], [], []>} : vector<8x32xbf16>, vector<32x128xbf16>, vector<8x128xf32> -> vector<8x128xf32>
    %46 = arith.addf %44, %45 : vector<8x128xf32>
    %cst_27 = arith.constant 5.000000e-01 : f32
    %47 = vector.broadcast %cst_27 : f32 to vector<8x128xf32>
    %48 = arith.mulf %47, %46 : vector<8x128xf32>
    %49 = math.tanh %48 : vector<8x128xf32>
    %cst_28 = arith.constant 1.000000e+00 : f32
    %50 = vector.broadcast %cst_28 : f32 to vector<8x128xf32>
    %51 = arith.addf %49, %50 : vector<8x128xf32>
    %cst_29 = arith.constant 5.000000e-01 : f32
    %52 = vector.broadcast %cst_29 : f32 to vector<8x128xf32>
    %53 = arith.mulf %52, %51 : vector<8x128xf32>
    %54 = math.tanh %46 : vector<8x128xf32>
    %55 = vector.extract_strided_slice %53 {offsets = [0, 0], sizes = [8, 32], strides = [1, 1]} : vector<8x128xf32> to vector<8x32xf32>
    %56 = vector.extract_strided_slice %53 {offsets = [0, 32], sizes = [8, 32], strides = [1, 1]} : vector<8x128xf32> to vector<8x32xf32>
    %57 = vector.extract_strided_slice %54 {offsets = [0, 64], sizes = [8, 32], strides = [1, 1]} : vector<8x128xf32> to vector<8x32xf32>
    %58 = vector.extract_strided_slice %53 {offsets = [0, 96], sizes = [8, 32], strides = [1, 1]} : vector<8x128xf32> to vector<8x32xf32>
    %59 = arith.mulf %56, %35 : vector<8x32xf32>
    %60 = arith.mulf %55, %57 : vector<8x32xf32>
    %61 = arith.addf %59, %60 : vector<8x32xf32>
    %62 = math.tanh %61 : vector<8x32xf32>
    %63 = arith.mulf %58, %62 : vector<8x32xf32>
    %64 = arith.index_cast %42 : i32 to index
    %c0_30 = arith.constant 0 : index
    %65 = vector.load %arg14[%64, %c0_30] : memref<64x32xf32, #tpu.memory_space<vmem>>, vector<8x32xf32>
    tpu.vector_store %arg14[%64, %c0_30], %63 {strides = array<i32>} : memref<64x32xf32, #tpu.memory_space<vmem>>, vector<8x32xf32>,
    %66 = arith.truncf %63 : vector<8x32xf32> to vector<8x32xbf16>
    %c2_i32 = arith.constant 2 : i32
    %c8_i32_31 = arith.constant 8 : i32
    %67 = arith.muli %c2_i32, %c8_i32_31 : i32
    %68 = tpu.assume_multiple %67, 8 : i32
    %69 = arith.index_cast %68 : i32 to index
    %c0_32 = arith.constant 0 : index
    %70 = vector.load %arg13[%69, %c0_32] : memref<64x128xf32, #tpu.memory_space<vmem>>, vector<8x128xf32>
    %cst_33 = arith.constant dense<0.000000e+00> : vector<8x128xf32>
    %71 = tpu.matmul %66, %9, %cst_33 {dimension_numbers = #tpu.dot_dimension_numbers<[1], [0], [0], [1], [0, 0, 1, 1], [], []>} : vector<8x32xbf16>, vector<32x128xbf16>, vector<8x128xf32> -> vector<8x128xf32>
    %72 = arith.addf %70, %71 : vector<8x128xf32>
    %cst_34 = arith.constant 5.000000e-01 : f32
    %73 = vector.broadcast %cst_34 : f32 to vector<8x128xf32>
    %74 = arith.mulf %73, %72 : vector<8x128xf32>
    %75 = math.tanh %74 : vector<8x128xf32>
    %cst_35 = arith.constant 1.000000e+00 : f32
    %76 = vector.broadcast %cst_35 : f32 to vector<8x128xf32>
    %77 = arith.addf %75, %76 : vector<8x128xf32>
    %cst_36 = arith.constant 5.000000e-01 : f32
    %78 = vector.broadcast %cst_36 : f32 to vector<8x128xf32>
    %79 = arith.mulf %78, %77 : vector<8x128xf32>
    %80 = math.tanh %72 : vector<8x128xf32>
    %81 = vector.extract_strided_slice %79 {offsets = [0, 0], sizes = [8, 32], strides = [1, 1]} : vector<8x128xf32> to vector<8x32xf32>
    %82 = vector.extract_strided_slice %79 {offsets = [0, 32], sizes = [8, 32], strides = [1, 1]} : vector<8x128xf32> to vector<8x32xf32>
    %83 = vector.extract_strided_slice %80 {offsets = [0, 64], sizes = [8, 32], strides = [1, 1]} : vector<8x128xf32> to vector<8x32xf32>
    %84 = vector.extract_strided_slice %79 {offsets = [0, 96], sizes = [8, 32], strides = [1, 1]} : vector<8x128xf32> to vector<8x32xf32>
    %85 = arith.mulf %82, %61 : vector<8x32xf32>
    %86 = arith.mulf %81, %83 : vector<8x32xf32>
    %87 = arith.addf %85, %86 : vector<8x32xf32>
    %88 = math.tanh %87 : vector<8x32xf32>
    %89 = arith.mulf %84, %88 : vector<8x32xf32>
    %90 = arith.index_cast %68 : i32 to index
    %c0_37 = arith.constant 0 : index
    %91 = vector.load %arg14[%90, %c0_37] : memref<64x32xf32, #tpu.memory_space<vmem>>, vector<8x32xf32>
    tpu.vector_store %arg14[%90, %c0_37], %89 {strides = array<i32>} : memref<64x32xf32, #tpu.memory_space<vmem>>, vector<8x32xf32>,
    %92 = arith.truncf %89 : vector<8x32xf32> to vector<8x32xbf16>
    %c3_i32 = arith.constant 3 : i32
    %c8_i32_38 = arith.constant 8 : i32
    %93 = arith.muli %c3_i32, %c8_i32_38 : i32
    %94 = tpu.assume_multiple %93, 8 : i32
    %95 = arith.index_cast %94 : i32 to index
    %c0_39 = arith.constant 0 : index
    %96 = vector.load %arg13[%95, %c0_39] : memref<64x128xf32, #tpu.memory_space<vmem>>, vector<8x128xf32>
    %cst_40 = arith.constant dense<0.000000e+00> : vector<8x128xf32>
    %97 = tpu.matmul %92, %9, %cst_40 {dimension_numbers = #tpu.dot_dimension_numbers<[1], [0], [0], [1], [0, 0, 1, 1], [], []>} : vector<8x32xbf16>, vector<32x128xbf16>, vector<8x128xf32> -> vector<8x128xf32>
    %98 = arith.addf %96, %97 : vector<8x128xf32>
    %cst_41 = arith.constant 5.000000e-01 : f32
    %99 = vector.broadcast %cst_41 : f32 to vector<8x128xf32>
    %100 = arith.mulf %99, %98 : vector<8x128xf32>
    %101 = math.tanh %100 : vector<8x128xf32>
    %cst_42 = arith.constant 1.000000e+00 : f32
    %102 = vector.broadcast %cst_42 : f32 to vector<8x128xf32>
    %103 = arith.addf %101, %102 : vector<8x128xf32>
    %cst_43 = arith.constant 5.000000e-01 : f32
    %104 = vector.broadcast %cst_43 : f32 to vector<8x128xf32>
    %105 = arith.mulf %104, %103 : vector<8x128xf32>
    %106 = math.tanh %98 : vector<8x128xf32>
    %107 = vector.extract_strided_slice %105 {offsets = [0, 0], sizes = [8, 32], strides = [1, 1]} : vector<8x128xf32> to vector<8x32xf32>
    %108 = vector.extract_strided_slice %105 {offsets = [0, 32], sizes = [8, 32], strides = [1, 1]} : vector<8x128xf32> to vector<8x32xf32>
    %109 = vector.extract_strided_slice %106 {offsets = [0, 64], sizes = [8, 32], strides = [1, 1]} : vector<8x128xf32> to vector<8x32xf32>
    %110 = vector.extract_strided_slice %105 {offsets = [0, 96], sizes = [8, 32], strides = [1, 1]} : vector<8x128xf32> to vector<8x32xf32>
    %111 = arith.mulf %108, %87 : vector<8x32xf32>
    %112 = arith.mulf %107, %109 : vector<8x32xf32>
    %113 = arith.addf %111, %112 : vector<8x32xf32>
    %114 = math.tanh %113 : vector<8x32xf32>
    %115 = arith.mulf %110, %114 : vector<8x32xf32>
    %116 = arith.index_cast %94 : i32 to index
    %c0_44 = arith.constant 0 : index
    %117 = vector.load %arg14[%116, %c0_44] : memref<64x32xf32, #tpu.memory_space<vmem>>, vector<8x32xf32>
    tpu.vector_store %arg14[%116, %c0_44], %115 {strides = array<i32>} : memref<64x32xf32, #tpu.memory_space<vmem>>, vector<8x32xf32>,
    %118 = arith.truncf %115 : vector<8x32xf32> to vector<8x32xbf16>
    %c4_i32 = arith.constant 4 : i32
    %c8_i32_45 = arith.constant 8 : i32
    %119 = arith.muli %c4_i32, %c8_i32_45 : i32
    %120 = tpu.assume_multiple %119, 8 : i32
    %121 = arith.index_cast %120 : i32 to index
    %c0_46 = arith.constant 0 : index
    %122 = vector.load %arg13[%121, %c0_46] : memref<64x128xf32, #tpu.memory_space<vmem>>, vector<8x128xf32>
    %cst_47 = arith.constant dense<0.000000e+00> : vector<8x128xf32>
    %123 = tpu.matmul %118, %9, %cst_47 {dimension_numbers = #tpu.dot_dimension_numbers<[1], [0], [0], [1], [0, 0, 1, 1], [], []>} : vector<8x32xbf16>, vector<32x128xbf16>, vector<8x128xf32> -> vector<8x128xf32>
    %124 = arith.addf %122, %123 : vector<8x128xf32>
    %cst_48 = arith.constant 5.000000e-01 : f32
    %125 = vector.broadcast %cst_48 : f32 to vector<8x128xf32>
    %126 = arith.mulf %125, %124 : vector<8x128xf32>
    %127 = math.tanh %126 : vector<8x128xf32>
    %cst_49 = arith.constant 1.000000e+00 : f32
    %128 = vector.broadcast %cst_49 : f32 to vector<8x128xf32>
    %129 = arith.addf %127, %128 : vector<8x128xf32>
    %cst_50 = arith.constant 5.000000e-01 : f32
    %130 = vector.broadcast %cst_50 : f32 to vector<8x128xf32>
    %131 = arith.mulf %130, %129 : vector<8x128xf32>
    %132 = math.tanh %124 : vector<8x128xf32>
    %133 = vector.extract_strided_slice %131 {offsets = [0, 0], sizes = [8, 32], strides = [1, 1]} : vector<8x128xf32> to vector<8x32xf32>
    %134 = vector.extract_strided_slice %131 {offsets = [0, 32], sizes = [8, 32], strides = [1, 1]} : vector<8x128xf32> to vector<8x32xf32>
    %135 = vector.extract_strided_slice %132 {offsets = [0, 64], sizes = [8, 32], strides = [1, 1]} : vector<8x128xf32> to vector<8x32xf32>
    %136 = vector.extract_strided_slice %131 {offsets = [0, 96], sizes = [8, 32], strides = [1, 1]} : vector<8x128xf32> to vector<8x32xf32>
    %137 = arith.mulf %134, %113 : vector<8x32xf32>
    %138 = arith.mulf %133, %135 : vector<8x32xf32>
    %139 = arith.addf %137, %138 : vector<8x32xf32>
    %140 = math.tanh %139 : vector<8x32xf32>
    %141 = arith.mulf %136, %140 : vector<8x32xf32>
    %142 = arith.index_cast %120 : i32 to index
    %c0_51 = arith.constant 0 : index
    %143 = vector.load %arg14[%142, %c0_51] : memref<64x32xf32, #tpu.memory_space<vmem>>, vector<8x32xf32>
    tpu.vector_store %arg14[%142, %c0_51], %141 {strides = array<i32>} : memref<64x32xf32, #tpu.memory_space<vmem>>, vector<8x32xf32>,
    %144 = arith.truncf %141 : vector<8x32xf32> to vector<8x32xbf16>
    %c5_i32 = arith.constant 5 : i32
    %c8_i32_52 = arith.constant 8 : i32
    %145 = arith.muli %c5_i32, %c8_i32_52 : i32
    %146 = tpu.assume_multiple %145, 8 : i32
    %147 = arith.index_cast %146 : i32 to index
    %c0_53 = arith.constant 0 : index
    %148 = vector.load %arg13[%147, %c0_53] : memref<64x128xf32, #tpu.memory_space<vmem>>, vector<8x128xf32>
    %cst_54 = arith.constant dense<0.000000e+00> : vector<8x128xf32>
    %149 = tpu.matmul %144, %9, %cst_54 {dimension_numbers = #tpu.dot_dimension_numbers<[1], [0], [0], [1], [0, 0, 1, 1], [], []>} : vector<8x32xbf16>, vector<32x128xbf16>, vector<8x128xf32> -> vector<8x128xf32>
    %150 = arith.addf %148, %149 : vector<8x128xf32>
    %cst_55 = arith.constant 5.000000e-01 : f32
    %151 = vector.broadcast %cst_55 : f32 to vector<8x128xf32>
    %152 = arith.mulf %151, %150 : vector<8x128xf32>
    %153 = math.tanh %152 : vector<8x128xf32>
    %cst_56 = arith.constant 1.000000e+00 : f32
    %154 = vector.broadcast %cst_56 : f32 to vector<8x128xf32>
    %155 = arith.addf %153, %154 : vector<8x128xf32>
    %cst_57 = arith.constant 5.000000e-01 : f32
    %156 = vector.broadcast %cst_57 : f32 to vector<8x128xf32>
    %157 = arith.mulf %156, %155 : vector<8x128xf32>
    %158 = math.tanh %150 : vector<8x128xf32>
    %159 = vector.extract_strided_slice %157 {offsets = [0, 0], sizes = [8, 32], strides = [1, 1]} : vector<8x128xf32> to vector<8x32xf32>
    %160 = vector.extract_strided_slice %157 {offsets = [0, 32], sizes = [8, 32], strides = [1, 1]} : vector<8x128xf32> to vector<8x32xf32>
    %161 = vector.extract_strided_slice %158 {offsets = [0, 64], sizes = [8, 32], strides = [1, 1]} : vector<8x128xf32> to vector<8x32xf32>
    %162 = vector.extract_strided_slice %157 {offsets = [0, 96], sizes = [8, 32], strides = [1, 1]} : vector<8x128xf32> to vector<8x32xf32>
    %163 = arith.mulf %160, %139 : vector<8x32xf32>
    %164 = arith.mulf %159, %161 : vector<8x32xf32>
    %165 = arith.addf %163, %164 : vector<8x32xf32>
    %166 = math.tanh %165 : vector<8x32xf32>
    %167 = arith.mulf %162, %166 : vector<8x32xf32>
    %168 = arith.index_cast %146 : i32 to index
    %c0_58 = arith.constant 0 : index
    %169 = vector.load %arg14[%168, %c0_58] : memref<64x32xf32, #tpu.memory_space<vmem>>, vector<8x32xf32>
    tpu.vector_store %arg14[%168, %c0_58], %167 {strides = array<i32>} : memref<64x32xf32, #tpu.memory_space<vmem>>, vector<8x32xf32>,
    %170 = arith.truncf %167 : vector<8x32xf32> to vector<8x32xbf16>
    %c6_i32 = arith.constant 6 : i32
    %c8_i32_59 = arith.constant 8 : i32
    %171 = arith.muli %c6_i32, %c8_i32_59 : i32
    %172 = tpu.assume_multiple %171, 8 : i32
    %173 = arith.index_cast %172 : i32 to index
    %c0_60 = arith.constant 0 : index
    %174 = vector.load %arg13[%173, %c0_60] : memref<64x128xf32, #tpu.memory_space<vmem>>, vector<8x128xf32>
    %cst_61 = arith.constant dense<0.000000e+00> : vector<8x128xf32>
    %175 = tpu.matmul %170, %9, %cst_61 {dimension_numbers = #tpu.dot_dimension_numbers<[1], [0], [0], [1], [0, 0, 1, 1], [], []>} : vector<8x32xbf16>, vector<32x128xbf16>, vector<8x128xf32> -> vector<8x128xf32>
    %176 = arith.addf %174, %175 : vector<8x128xf32>
    %cst_62 = arith.constant 5.000000e-01 : f32
    %177 = vector.broadcast %cst_62 : f32 to vector<8x128xf32>
    %178 = arith.mulf %177, %176 : vector<8x128xf32>
    %179 = math.tanh %178 : vector<8x128xf32>
    %cst_63 = arith.constant 1.000000e+00 : f32
    %180 = vector.broadcast %cst_63 : f32 to vector<8x128xf32>
    %181 = arith.addf %179, %180 : vector<8x128xf32>
    %cst_64 = arith.constant 5.000000e-01 : f32
    %182 = vector.broadcast %cst_64 : f32 to vector<8x128xf32>
    %183 = arith.mulf %182, %181 : vector<8x128xf32>
    %184 = math.tanh %176 : vector<8x128xf32>
    %185 = vector.extract_strided_slice %183 {offsets = [0, 0], sizes = [8, 32], strides = [1, 1]} : vector<8x128xf32> to vector<8x32xf32>
    %186 = vector.extract_strided_slice %183 {offsets = [0, 32], sizes = [8, 32], strides = [1, 1]} : vector<8x128xf32> to vector<8x32xf32>
    %187 = vector.extract_strided_slice %184 {offsets = [0, 64], sizes = [8, 32], strides = [1, 1]} : vector<8x128xf32> to vector<8x32xf32>
    %188 = vector.extract_strided_slice %183 {offsets = [0, 96], sizes = [8, 32], strides = [1, 1]} : vector<8x128xf32> to vector<8x32xf32>
    %189 = arith.mulf %186, %165 : vector<8x32xf32>
    %190 = arith.mulf %185, %187 : vector<8x32xf32>
    %191 = arith.addf %189, %190 : vector<8x32xf32>
    %192 = math.tanh %191 : vector<8x32xf32>
    %193 = arith.mulf %188, %192 : vector<8x32xf32>
    %194 = arith.index_cast %172 : i32 to index
    %c0_65 = arith.constant 0 : index
    %195 = vector.load %arg14[%194, %c0_65] : memref<64x32xf32, #tpu.memory_space<vmem>>, vector<8x32xf32>
    tpu.vector_store %arg14[%194, %c0_65], %193 {strides = array<i32>} : memref<64x32xf32, #tpu.memory_space<vmem>>, vector<8x32xf32>,
    %196 = arith.truncf %193 : vector<8x32xf32> to vector<8x32xbf16>
    %c7_i32 = arith.constant 7 : i32
    %c8_i32_66 = arith.constant 8 : i32
    %197 = arith.muli %c7_i32, %c8_i32_66 : i32
    %198 = tpu.assume_multiple %197, 8 : i32
    %199 = arith.index_cast %198 : i32 to index
    %c0_67 = arith.constant 0 : index
    %200 = vector.load %arg13[%199, %c0_67] : memref<64x128xf32, #tpu.memory_space<vmem>>, vector<8x128xf32>
    %cst_68 = arith.constant dense<0.000000e+00> : vector<8x128xf32>
    %201 = tpu.matmul %196, %9, %cst_68 {dimension_numbers = #tpu.dot_dimension_numbers<[1], [0], [0], [1], [0, 0, 1, 1], [], []>} : vector<8x32xbf16>, vector<32x128xbf16>, vector<8x128xf32> -> vector<8x128xf32>
    %202 = arith.addf %200, %201 : vector<8x128xf32>
    %cst_69 = arith.constant 5.000000e-01 : f32
    %203 = vector.broadcast %cst_69 : f32 to vector<8x128xf32>
    %204 = arith.mulf %203, %202 : vector<8x128xf32>
    %205 = math.tanh %204 : vector<8x128xf32>
    %cst_70 = arith.constant 1.000000e+00 : f32
    %206 = vector.broadcast %cst_70 : f32 to vector<8x128xf32>
    %207 = arith.addf %205, %206 : vector<8x128xf32>
    %cst_71 = arith.constant 5.000000e-01 : f32
    %208 = vector.broadcast %cst_71 : f32 to vector<8x128xf32>
    %209 = arith.mulf %208, %207 : vector<8x128xf32>
    %210 = math.tanh %202 : vector<8x128xf32>
    %211 = vector.extract_strided_slice %209 {offsets = [0, 0], sizes = [8, 32], strides = [1, 1]} : vector<8x128xf32> to vector<8x32xf32>
    %212 = vector.extract_strided_slice %209 {offsets = [0, 32], sizes = [8, 32], strides = [1, 1]} : vector<8x128xf32> to vector<8x32xf32>
    %213 = vector.extract_strided_slice %210 {offsets = [0, 64], sizes = [8, 32], strides = [1, 1]} : vector<8x128xf32> to vector<8x32xf32>
    %214 = vector.extract_strided_slice %209 {offsets = [0, 96], sizes = [8, 32], strides = [1, 1]} : vector<8x128xf32> to vector<8x32xf32>
    %215 = arith.mulf %212, %191 : vector<8x32xf32>
    %216 = arith.mulf %211, %213 : vector<8x32xf32>
    %217 = arith.addf %215, %216 : vector<8x32xf32>
    %218 = math.tanh %217 : vector<8x32xf32>
    %219 = arith.mulf %214, %218 : vector<8x32xf32>
    %220 = arith.index_cast %198 : i32 to index
    %c0_72 = arith.constant 0 : index
    %221 = vector.load %arg14[%220, %c0_72] : memref<64x32xf32, #tpu.memory_space<vmem>>, vector<8x32xf32>
    tpu.vector_store %arg14[%220, %c0_72], %219 {strides = array<i32>} : memref<64x32xf32, #tpu.memory_space<vmem>>, vector<8x32xf32>,
    %222 = arith.truncf %219 : vector<8x32xf32> to vector<8x32xbf16>
    %c8_i32_73 = arith.constant 8 : i32
    %c0_74 = arith.constant 0 : index
    %c0_75 = arith.constant 0 : index
    %223 = vector.load %arg14[%c0_74, %c0_75] : memref<64x32xf32, #tpu.memory_space<vmem>>, vector<64x32xf32>
    %224 = arith.truncf %223 : vector<64x32xf32> to vector<64x32xbf16>
    %c0_76 = arith.constant 0 : index
    %c0_77 = arith.constant 0 : index
    %225 = vector.load %arg5[%c0_76, %c0_77] : memref<32x128xbf16, #tpu.memory_space<vmem>>, vector<32x128xbf16>
    %cst_78 = arith.constant dense<0.000000e+00> : vector<64x128xf32>
    %226 = tpu.matmul %224, %225, %cst_78 {dimension_numbers = #tpu.dot_dimension_numbers<[1], [0], [0], [1], [0, 0, 1, 1], [], []>} : vector<64x32xbf16>, vector<32x128xbf16>, vector<64x128xf32> -> vector<64x128xf32>
    %c0_79 = arith.constant 0 : index
    %c0_80 = arith.constant 0 : index
    %227 = vector.load %arg9[%c0_79, %c0_80] : memref<1x128xf32, #tpu.memory_space<vmem>>, vector<1x128xf32>
    %228 = vector.broadcast %227 : vector<1x128xf32> to vector<64x128xf32>
    %229 = arith.addf %226, %228 : vector<64x128xf32>
    %c0_81 = arith.constant 0 : index
    %c0_82 = arith.constant 0 : index
    %230 = vector.load %arg13[%c0_81, %c0_82] : memref<64x128xf32, #tpu.memory_space<vmem>>, vector<64x128xf32>
    tpu.vector_store %arg13[%c0_81, %c0_82], %229 {strides = array<i32>} : memref<64x128xf32, #tpu.memory_space<vmem>>, vector<64x128xf32>,
    %c0_83 = arith.constant 0 : index
    %c0_84 = arith.constant 0 : index
    %231 = vector.load %arg7[%c0_83, %c0_84] : memref<32x128xbf16, #tpu.memory_space<vmem>>, vector<32x128xbf16>
    %c0_85 = arith.constant 0 : index
    %c1 = arith.constant 1 : index
    %c0_86 = arith.constant 0 : index
    %c0_87 = arith.constant 0 : index
    %232 = vector.load %arg2[%c0_85, %c1, %c0_86, %c0_87] : memref<1x2x8x32xf32, #tpu.memory_space<vmem>>, vector<1x1x8x32xf32>
    %233 = vector.shape_cast %232 : vector<1x1x8x32xf32> to vector<8x32xf32>
    %234 = arith.truncf %233 : vector<8x32xf32> to vector<8x32xbf16>
    %c0_88 = arith.constant 0 : index
    %c1_89 = arith.constant 1 : index
    %c0_90 = arith.constant 0 : index
    %c0_91 = arith.constant 0 : index
    %235 = vector.load %arg3[%c0_88, %c1_89, %c0_90, %c0_91] : memref<1x2x8x32xf32, #tpu.memory_space<vmem>>, vector<1x1x8x32xf32>
    %236 = vector.shape_cast %235 : vector<1x1x8x32xf32> to vector<8x32xf32>
    %c0_i32_92 = arith.constant 0 : i32
    %c8_i32_93 = arith.constant 8 : i32
    %237 = arith.muli %c0_i32_92, %c8_i32_93 : i32
    %238 = tpu.assume_multiple %237, 8 : i32
    %239 = arith.index_cast %238 : i32 to index
    %c0_94 = arith.constant 0 : index
    %240 = vector.load %arg13[%239, %c0_94] : memref<64x128xf32, #tpu.memory_space<vmem>>, vector<8x128xf32>
    %cst_95 = arith.constant dense<0.000000e+00> : vector<8x128xf32>
    %241 = tpu.matmul %234, %231, %cst_95 {dimension_numbers = #tpu.dot_dimension_numbers<[1], [0], [0], [1], [0, 0, 1, 1], [], []>} : vector<8x32xbf16>, vector<32x128xbf16>, vector<8x128xf32> -> vector<8x128xf32>
    %242 = arith.addf %240, %241 : vector<8x128xf32>
    %cst_96 = arith.constant 5.000000e-01 : f32
    %243 = vector.broadcast %cst_96 : f32 to vector<8x128xf32>
    %244 = arith.mulf %243, %242 : vector<8x128xf32>
    %245 = math.tanh %244 : vector<8x128xf32>
    %cst_97 = arith.constant 1.000000e+00 : f32
    %246 = vector.broadcast %cst_97 : f32 to vector<8x128xf32>
    %247 = arith.addf %245, %246 : vector<8x128xf32>
    %cst_98 = arith.constant 5.000000e-01 : f32
    %248 = vector.broadcast %cst_98 : f32 to vector<8x128xf32>
    %249 = arith.mulf %248, %247 : vector<8x128xf32>
    %250 = math.tanh %242 : vector<8x128xf32>
    %251 = vector.extract_strided_slice %249 {offsets = [0, 0], sizes = [8, 32], strides = [1, 1]} : vector<8x128xf32> to vector<8x32xf32>
    %252 = vector.extract_strided_slice %249 {offsets = [0, 32], sizes = [8, 32], strides = [1, 1]} : vector<8x128xf32> to vector<8x32xf32>
    %253 = vector.extract_strided_slice %250 {offsets = [0, 64], sizes = [8, 32], strides = [1, 1]} : vector<8x128xf32> to vector<8x32xf32>
    %254 = vector.extract_strided_slice %249 {offsets = [0, 96], sizes = [8, 32], strides = [1, 1]} : vector<8x128xf32> to vector<8x32xf32>
    %255 = arith.mulf %252, %236 : vector<8x32xf32>
    %256 = arith.mulf %251, %253 : vector<8x32xf32>
    %257 = arith.addf %255, %256 : vector<8x32xf32>
    %258 = math.tanh %257 : vector<8x32xf32>
    %259 = arith.mulf %254, %258 : vector<8x32xf32>
    %260 = arith.index_cast %238 : i32 to index
    %c0_99 = arith.constant 0 : index
    %261 = vector.load %arg14[%260, %c0_99] : memref<64x32xf32, #tpu.memory_space<vmem>>, vector<8x32xf32>
    tpu.vector_store %arg14[%260, %c0_99], %259 {strides = array<i32>} : memref<64x32xf32, #tpu.memory_space<vmem>>, vector<8x32xf32>,
    %262 = arith.truncf %259 : vector<8x32xf32> to vector<8x32xbf16>
    %c1_i32_100 = arith.constant 1 : i32
    %c8_i32_101 = arith.constant 8 : i32
    %263 = arith.muli %c1_i32_100, %c8_i32_101 : i32
    %264 = tpu.assume_multiple %263, 8 : i32
    %265 = arith.index_cast %264 : i32 to index
    %c0_102 = arith.constant 0 : index
    %266 = vector.load %arg13[%265, %c0_102] : memref<64x128xf32, #tpu.memory_space<vmem>>, vector<8x128xf32>
    %cst_103 = arith.constant dense<0.000000e+00> : vector<8x128xf32>
    %267 = tpu.matmul %262, %231, %cst_103 {dimension_numbers = #tpu.dot_dimension_numbers<[1], [0], [0], [1], [0, 0, 1, 1], [], []>} : vector<8x32xbf16>, vector<32x128xbf16>, vector<8x128xf32> -> vector<8x128xf32>
    %268 = arith.addf %266, %267 : vector<8x128xf32>
    %cst_104 = arith.constant 5.000000e-01 : f32
    %269 = vector.broadcast %cst_104 : f32 to vector<8x128xf32>
    %270 = arith.mulf %269, %268 : vector<8x128xf32>
    %271 = math.tanh %270 : vector<8x128xf32>
    %cst_105 = arith.constant 1.000000e+00 : f32
    %272 = vector.broadcast %cst_105 : f32 to vector<8x128xf32>
    %273 = arith.addf %271, %272 : vector<8x128xf32>
    %cst_106 = arith.constant 5.000000e-01 : f32
    %274 = vector.broadcast %cst_106 : f32 to vector<8x128xf32>
    %275 = arith.mulf %274, %273 : vector<8x128xf32>
    %276 = math.tanh %268 : vector<8x128xf32>
    %277 = vector.extract_strided_slice %275 {offsets = [0, 0], sizes = [8, 32], strides = [1, 1]} : vector<8x128xf32> to vector<8x32xf32>
    %278 = vector.extract_strided_slice %275 {offsets = [0, 32], sizes = [8, 32], strides = [1, 1]} : vector<8x128xf32> to vector<8x32xf32>
    %279 = vector.extract_strided_slice %276 {offsets = [0, 64], sizes = [8, 32], strides = [1, 1]} : vector<8x128xf32> to vector<8x32xf32>
    %280 = vector.extract_strided_slice %275 {offsets = [0, 96], sizes = [8, 32], strides = [1, 1]} : vector<8x128xf32> to vector<8x32xf32>
    %281 = arith.mulf %278, %257 : vector<8x32xf32>
    %282 = arith.mulf %277, %279 : vector<8x32xf32>
    %283 = arith.addf %281, %282 : vector<8x32xf32>
    %284 = math.tanh %283 : vector<8x32xf32>
    %285 = arith.mulf %280, %284 : vector<8x32xf32>
    %286 = arith.index_cast %264 : i32 to index
    %c0_107 = arith.constant 0 : index
    %287 = vector.load %arg14[%286, %c0_107] : memref<64x32xf32, #tpu.memory_space<vmem>>, vector<8x32xf32>
    tpu.vector_store %arg14[%286, %c0_107], %285 {strides = array<i32>} : memref<64x32xf32, #tpu.memory_space<vmem>>, vector<8x32xf32>,
    %288 = arith.truncf %285 : vector<8x32xf32> to vector<8x32xbf16>
    %c2_i32_108 = arith.constant 2 : i32
    %c8_i32_109 = arith.constant 8 : i32
    %289 = arith.muli %c2_i32_108, %c8_i32_109 : i32
    %290 = tpu.assume_multiple %289, 8 : i32
    %291 = arith.index_cast %290 : i32 to index
    %c0_110 = arith.constant 0 : index
    %292 = vector.load %arg13[%291, %c0_110] : memref<64x128xf32, #tpu.memory_space<vmem>>, vector<8x128xf32>
    %cst_111 = arith.constant dense<0.000000e+00> : vector<8x128xf32>
    %293 = tpu.matmul %288, %231, %cst_111 {dimension_numbers = #tpu.dot_dimension_numbers<[1], [0], [0], [1], [0, 0, 1, 1], [], []>} : vector<8x32xbf16>, vector<32x128xbf16>, vector<8x128xf32> -> vector<8x128xf32>
    %294 = arith.addf %292, %293 : vector<8x128xf32>
    %cst_112 = arith.constant 5.000000e-01 : f32
    %295 = vector.broadcast %cst_112 : f32 to vector<8x128xf32>
    %296 = arith.mulf %295, %294 : vector<8x128xf32>
    %297 = math.tanh %296 : vector<8x128xf32>
    %cst_113 = arith.constant 1.000000e+00 : f32
    %298 = vector.broadcast %cst_113 : f32 to vector<8x128xf32>
    %299 = arith.addf %297, %298 : vector<8x128xf32>
    %cst_114 = arith.constant 5.000000e-01 : f32
    %300 = vector.broadcast %cst_114 : f32 to vector<8x128xf32>
    %301 = arith.mulf %300, %299 : vector<8x128xf32>
    %302 = math.tanh %294 : vector<8x128xf32>
    %303 = vector.extract_strided_slice %301 {offsets = [0, 0], sizes = [8, 32], strides = [1, 1]} : vector<8x128xf32> to vector<8x32xf32>
    %304 = vector.extract_strided_slice %301 {offsets = [0, 32], sizes = [8, 32], strides = [1, 1]} : vector<8x128xf32> to vector<8x32xf32>
    %305 = vector.extract_strided_slice %302 {offsets = [0, 64], sizes = [8, 32], strides = [1, 1]} : vector<8x128xf32> to vector<8x32xf32>
    %306 = vector.extract_strided_slice %301 {offsets = [0, 96], sizes = [8, 32], strides = [1, 1]} : vector<8x128xf32> to vector<8x32xf32>
    %307 = arith.mulf %304, %283 : vector<8x32xf32>
    %308 = arith.mulf %303, %305 : vector<8x32xf32>
    %309 = arith.addf %307, %308 : vector<8x32xf32>
    %310 = math.tanh %309 : vector<8x32xf32>
    %311 = arith.mulf %306, %310 : vector<8x32xf32>
    %312 = arith.index_cast %290 : i32 to index
    %c0_115 = arith.constant 0 : index
    %313 = vector.load %arg14[%312, %c0_115] : memref<64x32xf32, #tpu.memory_space<vmem>>, vector<8x32xf32>
    tpu.vector_store %arg14[%312, %c0_115], %311 {strides = array<i32>} : memref<64x32xf32, #tpu.memory_space<vmem>>, vector<8x32xf32>,
    %314 = arith.truncf %311 : vector<8x32xf32> to vector<8x32xbf16>
    %c3_i32_116 = arith.constant 3 : i32
    %c8_i32_117 = arith.constant 8 : i32
    %315 = arith.muli %c3_i32_116, %c8_i32_117 : i32
    %316 = tpu.assume_multiple %315, 8 : i32
    %317 = arith.index_cast %316 : i32 to index
    %c0_118 = arith.constant 0 : index
    %318 = vector.load %arg13[%317, %c0_118] : memref<64x128xf32, #tpu.memory_space<vmem>>, vector<8x128xf32>
    %cst_119 = arith.constant dense<0.000000e+00> : vector<8x128xf32>
    %319 = tpu.matmul %314, %231, %cst_119 {dimension_numbers = #tpu.dot_dimension_numbers<[1], [0], [0], [1], [0, 0, 1, 1], [], []>} : vector<8x32xbf16>, vector<32x128xbf16>, vector<8x128xf32> -> vector<8x128xf32>
    %320 = arith.addf %318, %319 : vector<8x128xf32>
    %cst_120 = arith.constant 5.000000e-01 : f32
    %321 = vector.broadcast %cst_120 : f32 to vector<8x128xf32>
    %322 = arith.mulf %321, %320 : vector<8x128xf32>
    %323 = math.tanh %322 : vector<8x128xf32>
    %cst_121 = arith.constant 1.000000e+00 : f32
    %324 = vector.broadcast %cst_121 : f32 to vector<8x128xf32>
    %325 = arith.addf %323, %324 : vector<8x128xf32>
    %cst_122 = arith.constant 5.000000e-01 : f32
    %326 = vector.broadcast %cst_122 : f32 to vector<8x128xf32>
    %327 = arith.mulf %326, %325 : vector<8x128xf32>
    %328 = math.tanh %320 : vector<8x128xf32>
    %329 = vector.extract_strided_slice %327 {offsets = [0, 0], sizes = [8, 32], strides = [1, 1]} : vector<8x128xf32> to vector<8x32xf32>
    %330 = vector.extract_strided_slice %327 {offsets = [0, 32], sizes = [8, 32], strides = [1, 1]} : vector<8x128xf32> to vector<8x32xf32>
    %331 = vector.extract_strided_slice %328 {offsets = [0, 64], sizes = [8, 32], strides = [1, 1]} : vector<8x128xf32> to vector<8x32xf32>
    %332 = vector.extract_strided_slice %327 {offsets = [0, 96], sizes = [8, 32], strides = [1, 1]} : vector<8x128xf32> to vector<8x32xf32>
    %333 = arith.mulf %330, %309 : vector<8x32xf32>
    %334 = arith.mulf %329, %331 : vector<8x32xf32>
    %335 = arith.addf %333, %334 : vector<8x32xf32>
    %336 = math.tanh %335 : vector<8x32xf32>
    %337 = arith.mulf %332, %336 : vector<8x32xf32>
    %338 = arith.index_cast %316 : i32 to index
    %c0_123 = arith.constant 0 : index
    %339 = vector.load %arg14[%338, %c0_123] : memref<64x32xf32, #tpu.memory_space<vmem>>, vector<8x32xf32>
    tpu.vector_store %arg14[%338, %c0_123], %337 {strides = array<i32>} : memref<64x32xf32, #tpu.memory_space<vmem>>, vector<8x32xf32>,
    %340 = arith.truncf %337 : vector<8x32xf32> to vector<8x32xbf16>
    %c4_i32_124 = arith.constant 4 : i32
    %c8_i32_125 = arith.constant 8 : i32
    %341 = arith.muli %c4_i32_124, %c8_i32_125 : i32
    %342 = tpu.assume_multiple %341, 8 : i32
    %343 = arith.index_cast %342 : i32 to index
    %c0_126 = arith.constant 0 : index
    %344 = vector.load %arg13[%343, %c0_126] : memref<64x128xf32, #tpu.memory_space<vmem>>, vector<8x128xf32>
    %cst_127 = arith.constant dense<0.000000e+00> : vector<8x128xf32>
    %345 = tpu.matmul %340, %231, %cst_127 {dimension_numbers = #tpu.dot_dimension_numbers<[1], [0], [0], [1], [0, 0, 1, 1], [], []>} : vector<8x32xbf16>, vector<32x128xbf16>, vector<8x128xf32> -> vector<8x128xf32>
    %346 = arith.addf %344, %345 : vector<8x128xf32>
    %cst_128 = arith.constant 5.000000e-01 : f32
    %347 = vector.broadcast %cst_128 : f32 to vector<8x128xf32>
    %348 = arith.mulf %347, %346 : vector<8x128xf32>
    %349 = math.tanh %348 : vector<8x128xf32>
    %cst_129 = arith.constant 1.000000e+00 : f32
    %350 = vector.broadcast %cst_129 : f32 to vector<8x128xf32>
    %351 = arith.addf %349, %350 : vector<8x128xf32>
    %cst_130 = arith.constant 5.000000e-01 : f32
    %352 = vector.broadcast %cst_130 : f32 to vector<8x128xf32>
    %353 = arith.mulf %352, %351 : vector<8x128xf32>
    %354 = math.tanh %346 : vector<8x128xf32>
    %355 = vector.extract_strided_slice %353 {offsets = [0, 0], sizes = [8, 32], strides = [1, 1]} : vector<8x128xf32> to vector<8x32xf32>
    %356 = vector.extract_strided_slice %353 {offsets = [0, 32], sizes = [8, 32], strides = [1, 1]} : vector<8x128xf32> to vector<8x32xf32>
    %357 = vector.extract_strided_slice %354 {offsets = [0, 64], sizes = [8, 32], strides = [1, 1]} : vector<8x128xf32> to vector<8x32xf32>
    %358 = vector.extract_strided_slice %353 {offsets = [0, 96], sizes = [8, 32], strides = [1, 1]} : vector<8x128xf32> to vector<8x32xf32>
    %359 = arith.mulf %356, %335 : vector<8x32xf32>
    %360 = arith.mulf %355, %357 : vector<8x32xf32>
    %361 = arith.addf %359, %360 : vector<8x32xf32>
    %362 = math.tanh %361 : vector<8x32xf32>
    %363 = arith.mulf %358, %362 : vector<8x32xf32>
    %364 = arith.index_cast %342 : i32 to index
    %c0_131 = arith.constant 0 : index
    %365 = vector.load %arg14[%364, %c0_131] : memref<64x32xf32, #tpu.memory_space<vmem>>, vector<8x32xf32>
    tpu.vector_store %arg14[%364, %c0_131], %363 {strides = array<i32>} : memref<64x32xf32, #tpu.memory_space<vmem>>, vector<8x32xf32>,
    %366 = arith.truncf %363 : vector<8x32xf32> to vector<8x32xbf16>
    %c5_i32_132 = arith.constant 5 : i32
    %c8_i32_133 = arith.constant 8 : i32
    %367 = arith.muli %c5_i32_132, %c8_i32_133 : i32
    %368 = tpu.assume_multiple %367, 8 : i32
    %369 = arith.index_cast %368 : i32 to index
    %c0_134 = arith.constant 0 : index
    %370 = vector.load %arg13[%369, %c0_134] : memref<64x128xf32, #tpu.memory_space<vmem>>, vector<8x128xf32>
    %cst_135 = arith.constant dense<0.000000e+00> : vector<8x128xf32>
    %371 = tpu.matmul %366, %231, %cst_135 {dimension_numbers = #tpu.dot_dimension_numbers<[1], [0], [0], [1], [0, 0, 1, 1], [], []>} : vector<8x32xbf16>, vector<32x128xbf16>, vector<8x128xf32> -> vector<8x128xf32>
    %372 = arith.addf %370, %371 : vector<8x128xf32>
    %cst_136 = arith.constant 5.000000e-01 : f32
    %373 = vector.broadcast %cst_136 : f32 to vector<8x128xf32>
    %374 = arith.mulf %373, %372 : vector<8x128xf32>
    %375 = math.tanh %374 : vector<8x128xf32>
    %cst_137 = arith.constant 1.000000e+00 : f32
    %376 = vector.broadcast %cst_137 : f32 to vector<8x128xf32>
    %377 = arith.addf %375, %376 : vector<8x128xf32>
    %cst_138 = arith.constant 5.000000e-01 : f32
    %378 = vector.broadcast %cst_138 : f32 to vector<8x128xf32>
    %379 = arith.mulf %378, %377 : vector<8x128xf32>
    %380 = math.tanh %372 : vector<8x128xf32>
    %381 = vector.extract_strided_slice %379 {offsets = [0, 0], sizes = [8, 32], strides = [1, 1]} : vector<8x128xf32> to vector<8x32xf32>
    %382 = vector.extract_strided_slice %379 {offsets = [0, 32], sizes = [8, 32], strides = [1, 1]} : vector<8x128xf32> to vector<8x32xf32>
    %383 = vector.extract_strided_slice %380 {offsets = [0, 64], sizes = [8, 32], strides = [1, 1]} : vector<8x128xf32> to vector<8x32xf32>
    %384 = vector.extract_strided_slice %379 {offsets = [0, 96], sizes = [8, 32], strides = [1, 1]} : vector<8x128xf32> to vector<8x32xf32>
    %385 = arith.mulf %382, %361 : vector<8x32xf32>
    %386 = arith.mulf %381, %383 : vector<8x32xf32>
    %387 = arith.addf %385, %386 : vector<8x32xf32>
    %388 = math.tanh %387 : vector<8x32xf32>
    %389 = arith.mulf %384, %388 : vector<8x32xf32>
    %390 = arith.index_cast %368 : i32 to index
    %c0_139 = arith.constant 0 : index
    %391 = vector.load %arg14[%390, %c0_139] : memref<64x32xf32, #tpu.memory_space<vmem>>, vector<8x32xf32>
    tpu.vector_store %arg14[%390, %c0_139], %389 {strides = array<i32>} : memref<64x32xf32, #tpu.memory_space<vmem>>, vector<8x32xf32>,
    %392 = arith.truncf %389 : vector<8x32xf32> to vector<8x32xbf16>
    %c6_i32_140 = arith.constant 6 : i32
    %c8_i32_141 = arith.constant 8 : i32
    %393 = arith.muli %c6_i32_140, %c8_i32_141 : i32
    %394 = tpu.assume_multiple %393, 8 : i32
    %395 = arith.index_cast %394 : i32 to index
    %c0_142 = arith.constant 0 : index
    %396 = vector.load %arg13[%395, %c0_142] : memref<64x128xf32, #tpu.memory_space<vmem>>, vector<8x128xf32>
    %cst_143 = arith.constant dense<0.000000e+00> : vector<8x128xf32>
    %397 = tpu.matmul %392, %231, %cst_143 {dimension_numbers = #tpu.dot_dimension_numbers<[1], [0], [0], [1], [0, 0, 1, 1], [], []>} : vector<8x32xbf16>, vector<32x128xbf16>, vector<8x128xf32> -> vector<8x128xf32>
    %398 = arith.addf %396, %397 : vector<8x128xf32>
    %cst_144 = arith.constant 5.000000e-01 : f32
    %399 = vector.broadcast %cst_144 : f32 to vector<8x128xf32>
    %400 = arith.mulf %399, %398 : vector<8x128xf32>
    %401 = math.tanh %400 : vector<8x128xf32>
    %cst_145 = arith.constant 1.000000e+00 : f32
    %402 = vector.broadcast %cst_145 : f32 to vector<8x128xf32>
    %403 = arith.addf %401, %402 : vector<8x128xf32>
    %cst_146 = arith.constant 5.000000e-01 : f32
    %404 = vector.broadcast %cst_146 : f32 to vector<8x128xf32>
    %405 = arith.mulf %404, %403 : vector<8x128xf32>
    %406 = math.tanh %398 : vector<8x128xf32>
    %407 = vector.extract_strided_slice %405 {offsets = [0, 0], sizes = [8, 32], strides = [1, 1]} : vector<8x128xf32> to vector<8x32xf32>
    %408 = vector.extract_strided_slice %405 {offsets = [0, 32], sizes = [8, 32], strides = [1, 1]} : vector<8x128xf32> to vector<8x32xf32>
    %409 = vector.extract_strided_slice %406 {offsets = [0, 64], sizes = [8, 32], strides = [1, 1]} : vector<8x128xf32> to vector<8x32xf32>
    %410 = vector.extract_strided_slice %405 {offsets = [0, 96], sizes = [8, 32], strides = [1, 1]} : vector<8x128xf32> to vector<8x32xf32>
    %411 = arith.mulf %408, %387 : vector<8x32xf32>
    %412 = arith.mulf %407, %409 : vector<8x32xf32>
    %413 = arith.addf %411, %412 : vector<8x32xf32>
    %414 = math.tanh %413 : vector<8x32xf32>
    %415 = arith.mulf %410, %414 : vector<8x32xf32>
    %416 = arith.index_cast %394 : i32 to index
    %c0_147 = arith.constant 0 : index
    %417 = vector.load %arg14[%416, %c0_147] : memref<64x32xf32, #tpu.memory_space<vmem>>, vector<8x32xf32>
    tpu.vector_store %arg14[%416, %c0_147], %415 {strides = array<i32>} : memref<64x32xf32, #tpu.memory_space<vmem>>, vector<8x32xf32>,
    %418 = arith.truncf %415 : vector<8x32xf32> to vector<8x32xbf16>
    %c7_i32_148 = arith.constant 7 : i32
    %c8_i32_149 = arith.constant 8 : i32
    %419 = arith.muli %c7_i32_148, %c8_i32_149 : i32
    %420 = tpu.assume_multiple %419, 8 : i32
    %421 = arith.index_cast %420 : i32 to index
    %c0_150 = arith.constant 0 : index
    %422 = vector.load %arg13[%421, %c0_150] : memref<64x128xf32, #tpu.memory_space<vmem>>, vector<8x128xf32>
    %cst_151 = arith.constant dense<0.000000e+00> : vector<8x128xf32>
    %423 = tpu.matmul %418, %231, %cst_151 {dimension_numbers = #tpu.dot_dimension_numbers<[1], [0], [0], [1], [0, 0, 1, 1], [], []>} : vector<8x32xbf16>, vector<32x128xbf16>, vector<8x128xf32> -> vector<8x128xf32>
    %424 = arith.addf %422, %423 : vector<8x128xf32>
    %cst_152 = arith.constant 5.000000e-01 : f32
    %425 = vector.broadcast %cst_152 : f32 to vector<8x128xf32>
    %426 = arith.mulf %425, %424 : vector<8x128xf32>
    %427 = math.tanh %426 : vector<8x128xf32>
    %cst_153 = arith.constant 1.000000e+00 : f32
    %428 = vector.broadcast %cst_153 : f32 to vector<8x128xf32>
    %429 = arith.addf %427, %428 : vector<8x128xf32>
    %cst_154 = arith.constant 5.000000e-01 : f32
    %430 = vector.broadcast %cst_154 : f32 to vector<8x128xf32>
    %431 = arith.mulf %430, %429 : vector<8x128xf32>
    %432 = math.tanh %424 : vector<8x128xf32>
    %433 = vector.extract_strided_slice %431 {offsets = [0, 0], sizes = [8, 32], strides = [1, 1]} : vector<8x128xf32> to vector<8x32xf32>
    %434 = vector.extract_strided_slice %431 {offsets = [0, 32], sizes = [8, 32], strides = [1, 1]} : vector<8x128xf32> to vector<8x32xf32>
    %435 = vector.extract_strided_slice %432 {offsets = [0, 64], sizes = [8, 32], strides = [1, 1]} : vector<8x128xf32> to vector<8x32xf32>
    %436 = vector.extract_strided_slice %431 {offsets = [0, 96], sizes = [8, 32], strides = [1, 1]} : vector<8x128xf32> to vector<8x32xf32>
    %437 = arith.mulf %434, %413 : vector<8x32xf32>
    %438 = arith.mulf %433, %435 : vector<8x32xf32>
    %439 = arith.addf %437, %438 : vector<8x32xf32>
    %440 = math.tanh %439 : vector<8x32xf32>
    %441 = arith.mulf %436, %440 : vector<8x32xf32>
    %442 = arith.index_cast %420 : i32 to index
    %c0_155 = arith.constant 0 : index
    %443 = vector.load %arg14[%442, %c0_155] : memref<64x32xf32, #tpu.memory_space<vmem>>, vector<8x32xf32>
    tpu.vector_store %arg14[%442, %c0_155], %441 {strides = array<i32>} : memref<64x32xf32, #tpu.memory_space<vmem>>, vector<8x32xf32>,
    %444 = arith.truncf %441 : vector<8x32xf32> to vector<8x32xbf16>
    %c8_i32_156 = arith.constant 8 : i32
    %c0_157 = arith.constant 0 : index
    %c0_158 = arith.constant 0 : index
    %445 = vector.load %arg14[%c0_157, %c0_158] : memref<64x32xf32, #tpu.memory_space<vmem>>, vector<64x32xf32>
    %446 = arith.truncf %445 : vector<64x32xf32> to vector<64x32xbf16>
    %c0_159 = arith.constant 0 : index
    %c0_160 = arith.constant 0 : index
    %447 = vector.load %arg10[%c0_159, %c0_160] : memref<32x128xbf16, #tpu.memory_space<vmem>>, vector<32x128xbf16>
    %cst_161 = arith.constant dense<0.000000e+00> : vector<64x128xf32>
    %448 = tpu.matmul %446, %447, %cst_161 {dimension_numbers = #tpu.dot_dimension_numbers<[1], [0], [0], [1], [0, 0, 1, 1], [], []>} : vector<64x32xbf16>, vector<32x128xbf16>, vector<64x128xf32> -> vector<64x128xf32>
    %c0_162 = arith.constant 0 : index
    %c0_163 = arith.constant 0 : index
    %449 = vector.load %arg11[%c0_162, %c0_163] : memref<1x128xf32, #tpu.memory_space<vmem>>, vector<1x128xf32>
    %450 = vector.broadcast %449 : vector<1x128xf32> to vector<64x128xf32>
    %451 = arith.addf %448, %450 : vector<64x128xf32>
    %c0_164 = arith.constant 0 : index
    %c0_165 = arith.constant 0 : index
    %c0_166 = arith.constant 0 : index
    %452 = vector.load %arg12[%c0_164, %c0_165, %c0_166] : memref<1x64x128xf32, #tpu.memory_space<vmem>>, vector<1x64x128xf32>
    %453 = vector.shape_cast %452 : vector<1x64x128xf32> to vector<64x128xf32>
    %454 = vector.shape_cast %451 : vector<64x128xf32> to vector<1x64x128xf32>
    tpu.vector_store %arg12[%c0_164, %c0_165, %c0_166], %454 {strides = array<i32>} : memref<1x64x128xf32, #tpu.memory_space<vmem>>, vector<1x64x128xf32>,
    return
  }
  func.func @transform_0(%arg0: i32) -> (i32, i32, i32) {
    %c0_i32 = arith.constant 0 : i32
    %c0_i32_0 = arith.constant 0 : i32
    %c0_i32_1 = arith.constant 0 : i32
    return %arg0, %c0_i32, %c0_i32_0 : i32, i32, i32
  }
  func.func @transform_1(%arg0: i32) -> (i32, i32, i32, i32) {
    %c0_i32 = arith.constant 0 : i32
    %c0_i32_0 = arith.constant 0 : i32
    %c0_i32_1 = arith.constant 0 : i32
    %c0_i32_2 = arith.constant 0 : i32
    return %arg0, %c0_i32, %c0_i32_0, %c0_i32_1 : i32, i32, i32, i32
  }
  func.func @transform_2(%arg0: i32) -> (i32, i32, i32, i32) {
    %c0_i32 = arith.constant 0 : i32
    %c0_i32_0 = arith.constant 0 : i32
    %c0_i32_1 = arith.constant 0 : i32
    %c0_i32_2 = arith.constant 0 : i32
    return %arg0, %c0_i32, %c0_i32_0, %c0_i32_1 : i32, i32, i32, i32
  }
  func.func @transform_3(%arg0: i32) -> (i32, i32) {
    %c0_i32 = arith.constant 0 : i32
    %c0_i32_0 = arith.constant 0 : i32
    %c0_i32_1 = arith.constant 0 : i32
    return %c0_i32, %c0_i32_0 : i32, i32
  }
  func.func @transform_4(%arg0: i32) -> (i32, i32) {
    %c0_i32 = arith.constant 0 : i32
    %c0_i32_0 = arith.constant 0 : i32
    %c0_i32_1 = arith.constant 0 : i32
    return %c0_i32, %c0_i32_0 : i32, i32
  }
  func.func @transform_5(%arg0: i32) -> (i32, i32) {
    %c0_i32 = arith.constant 0 : i32
    %c0_i32_0 = arith.constant 0 : i32
    %c0_i32_1 = arith.constant 0 : i32
    return %c0_i32, %c0_i32_0 : i32, i32
  }
  func.func @transform_6(%arg0: i32) -> (i32, i32) {
    %c0_i32 = arith.constant 0 : i32
    %c0_i32_0 = arith.constant 0 : i32
    %c0_i32_1 = arith.constant 0 : i32
    return %c0_i32, %c0_i32_0 : i32, i32
  }
  func.func @transform_7(%arg0: i32) -> (i32, i32) {
    %c0_i32 = arith.constant 0 : i32
    %c0_i32_0 = arith.constant 0 : i32
    %c0_i32_1 = arith.constant 0 : i32
    return %c0_i32, %c0_i32_0 : i32, i32
  }
  func.func @transform_8(%arg0: i32) -> (i32, i32) {
    %c0_i32 = arith.constant 0 : i32
    %c0_i32_0 = arith.constant 0 : i32
    %c0_i32_1 = arith.constant 0 : i32
    return %c0_i32, %c0_i32_0 : i32, i32
  }
  func.func @transform_9(%arg0: i32) -> (i32, i32) {
    %c0_i32 = arith.constant 0 : i32
    %c0_i32_0 = arith.constant 0 : i32
    %c0_i32_1 = arith.constant 0 : i32
    return %c0_i32, %c0_i32_0 : i32, i32
  }
  func.func @transform_10(%arg0: i32) -> (i32, i32) {
    %c0_i32 = arith.constant 0 : i32
    %c0_i32_0 = arith.constant 0 : i32
    %c0_i32_1 = arith.constant 0 : i32
    return %c0_i32, %c0_i32_0 : i32, i32
  }
  func.func @transform_11(%arg0: i32) -> (i32, i32, i32) {
    %c0_i32 = arith.constant 0 : i32
    %c0_i32_0 = arith.constant 0 : i32
    %c0_i32_1 = arith.constant 0 : i32
    return %arg0, %c0_i32, %c0_i32_0 : i32, i32, i32
  }
}

</mosaic_0001>

<bundles_post_ra>
// kernel: network_forward.1
= control target key start
LH: loop header
LB: loop body
LE: loop exit
PB: predicated region body
PF: predicated region fallthrough
CT: control target
= control target key end

     0   :  { %vm72_vm0 = vcmask 1041408   ;;  %vm59_vm1 = vcmask 31744   ;;  %v2044_v14 = vmov 0.0   ;;  %vm2045_vm2 = vmmov 0   ;;  %s2047_s23 = smov 32   ;;  %s2547_s3 = inlined_call_operand.vmem [shape: bf16[4,128], index: 3, kind: input, shape index: {}]   ;;  %s2548_s0 = inlined_call_operand.vmem [shape: f32[1,64,4], index: 0, kind: input, shape index: {}]   ;;  %s2549_s5 = inlined_call_operand.vmem [shape: bf16[32,128], index: 5, kind: input, shape index: {}]   ;;  %s2550_s1 = inlined_call_operand.vmem [shape: f32[1,2,8,32], index: 1, kind: input, shape index: {}]   ;;  %s2551_s7 = inlined_call_operand.vmem [shape: f32[1,128], index: 7, kind: input, shape index: {}]   ;;  %s2552_s2 = inlined_call_operand.vmem [shape: f32[1,2,8,32], index: 2, kind: input, shape index: {}]   ;;  %s2553_s4 = inlined_call_operand.vmem [shape: bf16[32,128], index: 4, kind: input, shape index: {}]   ;;  %s2554_s6 = inlined_call_operand.vmem [shape: bf16[32,128], index: 6, kind: input, shape index: {}]   ;;  %s2555_s8 = inlined_call_operand.vmem [shape: f32[1,128], index: 8, kind: input, shape index: {}]   ;;  %s2556_s9 = inlined_call_operand.vmem [shape: bf16[32,128], index: 9, kind: input, shape index: {}]   ;;  %s2557_s10 = inlined_call_operand.vmem [shape: f32[1,128], index: 10, kind: input, shape index: {}]   ;;  %s2558_s11 = inlined_call_operand.vmem [shape: f32[1,64,128], index: 11, kind: output, shape index: {}]  }
   0x1   :  { %v51_v0 = vld [vmem:[%s2547_s3] sm:$0x3]  ;;  %v40_v2 = vld [vmem:[%s2548_s0 + $0x8] sm:$0xff]  ;;  %v41_v7 = vld [vmem:[%s2548_s0 + $0x10] sm:$0xff]  ;;  %vm169_vm3 = vcmask 261120  }
   0x2   :  { %v39_v1 = vld [vmem:[%s2548_s0] sm:$0xff]  ;;  %1934 = vmatprep.subr.msk.bf16.mxu0 %vm72_vm0, %v51_v0  ;;  %1935 = vmatprep.subr.msk.bf16.mxu1 %vm72_vm0, %v51_v0  ;;  %v74_v3 = vsel %vm72_vm0, %v51_v0, 0  ;;  %v44_v6 = vld [vmem:[%s2548_s0 + $0x28] sm:$0xff]  ;;  %v42_v9 = vld [vmem:[%s2548_s0 + $0x18] sm:$0xff] }
   0x3   :  { %v47_v4 = vpack.c.bf16 %v40_v2, %v39_v1  ;;  %v43_v5 = vld [vmem:[%s2548_s0 + $0x20] sm:$0xff]  ;;  %1771 = vmatpush3.bf16.msra.mxu0 %v74_v3  ;;  %1933 = vmatpush3.bf16.msra.mxu1 %v74_v3  ;;  %v45_v10 = vld [vmem:[%s2548_s0 + $0x30] sm:$0xff]  ;;  %v46_v11 = vld [vmem:[%s2548_s0 + $0x38] sm:$0xff]  ;;  %v48_v12 = vpack.c.bf16 %v42_v9, %v41_v7 }
   0x4   :  { %v49_v8 = vpack.c.bf16 %v44_v6, %v43_v5  ;;  %v50_v13 = vpack.c.bf16 %v46_v11, %v45_v10  ;;  %1780 = vmatprep.subr.bf16.mxu1 %v2044_v14  ;;  %v2140_v15 = vld [vmem:[%s2549_s5 + $0x8] sm:$0xff]   ;;  %1796 = vmatprep.subr.bf16.mxu0 %v2044_v14  ;;  %v2150_v16 = vld [vmem:[%s2549_s5] sm:$0xff]  }
   0x5   :  { %1772 = vmatprep.mubr.msk.bf16.mxu0 %vm59_vm1, %v47_v4  ;;  %v153_v17 = vld [vmem:[%s2550_s1] sm:$0xff] }
   0x6   :  { %1776 = vmatprep.mubr.msk.bf16.mxu1 %vm59_vm1, %v49_v8  ;;  %1773 = vmatmul.mubr.msk.bf16.vlgmr.msra.gmra.mxu0 %vm59_vm1, %v48_v12  ;;  %v154_v18 = vpack.c.bf16 %v153_v17, %v153_v17  ;;  %v1664_v19 = vld [vmem:[%s2551_s7] ss:$0 sm:$0xff]  ;;  %s2046_s7 = smov 64  }
   0x7   :  { %1777 = vmatmul.mubr.msk.bf16.vlgmr.msra.gmra.mxu1 %vm59_vm1, %v50_v13  ;;  %1797 = vmatpush3.bf16.msra.mxu0 %v2140_v15  ;;  %v155_v40 = vld [vmem:[%s2552_s2] sm:$0xff] }
   0x8   :  { %1781 = vmatpush3.bf16.msra.mxu1 %v2140_v15  ;;  %1784 = vmatprep.mubr.msk.bf16.mxu1 %vm2045_vm2, %v2044_v14 }
   0x9   :  { %1782 = vmatprep.subr.bf16.mxu1 %v2044_v14  ;;  %1798 = vmatprep.subr.bf16.mxu0 %v2044_v14 }
   0xa   :  { %1800 = vmatprep.mubr.msk.bf16.mxu0 %vm2045_vm2, %v2044_v14 }
   0xb   :  { %1799 = vmatpush3.bf16.msra.mxu0 %v2150_v16 }
   0xc   :  { %1783 = vmatpush3.bf16.msra.mxu1 %v2150_v16  ;;  %1812 = vmatprep.subr.bf16.mxu0 %v2044_v14 }
   0xd   :  { %1788 = vmatprep.subr.bf16.mxu1 %v2044_v14 }
   0xf   :  { %1785 = vmatmul.mubr.msk.bf16.vlgmr.msra.gmra.mxu1 %vm169_vm3, %v154_v18 }
  0x10   :  { %1789 = vmatpush3.bf16.msra.mxu1 %v2140_v15  ;;  %1792 = vmatprep.mubr.msk.bf16.mxu1 %vm2045_vm2, %v2044_v14 }
  0x11   :  { %1790 = vmatprep.subr.bf16.mxu1 %v2044_v14 }
  0x14   :  { %1791 = vmatpush3.bf16.msra.mxu1 %v2150_v16 }
  0x15   :  { %1804 = vmatprep.subr.bf16.mxu1 %v2044_v14 }
  0xc6   :  { %v1774_v20 = vpop.f32.mrf.mxu0 }
  0xc7   :  { %v1778_v21 = vpop.f32.mrf.mxu1  ;;  %v2176_v22 = vadd.f32 %v1774_v20, %v1664_v19 }
  0xc8   :  { %v2178_v23 = vadd.f32 %v1778_v21, %v1664_v19  ;;  %v110_v24 = vpop.f32.mrf.mxu0 }
  0xc9   :  { %v126_v25 = vpop.f32.mrf.mxu1  ;;  %v111_v32 = vadd.f32 %v1664_v19, %v110_v24 }
  0xca   :  { %v2180_v26 = vadd.f32 %v1664_v19, %v126_v25  ;;  %v1775_v27 = vpop.f32.mrf.mxu0 }
  0xcb   :  { %v1779_v28 = vpop.f32.mrf.mxu1  ;;  %v2182_v29 = vadd.f32 %v1775_v27, %v1664_v19 }
  0xcc   :  { %v2184_v30 = vadd.f32 %v1779_v28, %v1664_v19  ;;  %v113_v56 = vpop.f32.mrf.mxu0 }
  0xcd   :  { %v129_v31 = vpop.f32.mrf.mxu1  ;;  %v114_v57 = vadd.f32 %v1664_v19, %v113_v56 }
  0xce   :  { %v2186_v33 = vadd.f32 %v1664_v19, %v129_v31 }
  0xcf   :  { %v207_v34 = vpop.f32.mrf.mxu1 }
  0xd0   :  { %v213_v35 = vadd.f32 %v207_v34, %v111_v32 }
  0xd1   :  { %v1786_v36 = vpop.f32.mrf.mxu1 }
  0xd2   :  { %1948 = vtanh.f32 %v213_v35  ;;  %v214_v41 = vmul.f32 0.5, %v213_v35 }
  0xd3   :  { %v210_v37 = vpop.f32.mrf.mxu1 }
  0xd4   :  { %1950 = vtanh.f32 %v214_v41 }
  0xd5   :  { %v1787_v38 = vpop.f32.mrf.mxu1 }
  0xdf   :  { %v1949_v39 = vpop.eup %1948 }
  0xe0   :  { %225 = vrot.lane.b32.xlu0 %v1949_v39, %s2046_s7 }
  0xe1   :  { %v1951_v42 = vpop.eup %1950 }
  0xe2   :  { %v216_v43 = vadd.f32 1.0, %v1951_v42 }
  0xe4   :  { %220 = vrot.lane.b32.xlu0 %v155_v40, %s2047_s23  ;;  %v217_v44 = vmul.f32 0.5, %v216_v43 }
 0x152   :  { %v226_v45 = vpop.permute.xlu0 %225 }
 0x153   :  { %v228_v46 = vmul.f32 %v226_v45, %v217_v44 }
 0x155   :  { %230 = vrot.lane.b32.xlu1 %v228_v46, %s2047_s23 }
 0x156   :  { %v221_v47 = vpop.permute.xlu0 %220 }
 0x157   :  { %v223_v48 = vmul.f32 %v221_v47, %v217_v44 }
 0x1c7   :  { %v231_v49 = vpop.permute.xlu1 %230 }
 0x1c8   :  { %v233_v50 = vadd.f32 %v231_v49, %v223_v48 }
 0x1ca   :  { %1952 = vtanh.f32 %v233_v50 }
 0x1d7   :  { %v1953_v51 = vpop.eup %1952 }
 0x1d8   :  { %236 = vrot.lane.b32.xlu1 %v1953_v51, %s2046_s7 }
 0x24a   :  { %v237_v52 = vpop.permute.xlu1 %236 }
 0x24b   :  { %v2195_v53 = vmul.f32 %v237_v52, %v217_v44 }
 0x24d   :  { %v245_v54 = vpack.c.bf16 %v2195_v53, %v2195_v53 }
 0x24f   :  { %249 = vrot.lane.b32.xlu0 %v245_v54, %s2047_s23 }
 0x2c1   :  { %v250_v55 = vpop.permute.xlu0 %249 }
 0x2c2   :  { %1793 = vmatmul.mubr.msk.bf16.vlgmr.msra.gmra.mxu1 %vm169_vm3, %v250_v55 }
 0x2c3   :  { %1805 = vmatpush3.bf16.msra.mxu1 %v2140_v15  ;;  %1808 = vmatprep.mubr.msk.bf16.mxu1 %vm2045_vm2, %v2044_v14 }
 0x2c4   :  { %1806 = vmatprep.subr.bf16.mxu1 %v2044_v14 }
 0x2c7   :  { %1807 = vmatpush3.bf16.msra.mxu1 %v2150_v16 }
 0x2c8   :  { %1820 = vmatprep.subr.bf16.mxu1 %v2044_v14 }
 0x382   :  { %v288_v58 = vpop.f32.mrf.mxu1 }
 0x383   :  { %v294_v59 = vadd.f32 %v288_v58, %v114_v57 }
 0x384   :  { %v1794_v60 = vpop.f32.mrf.mxu1 }
 0x385   :  { %1954 = vtanh.f32 %v294_v59  ;;  %v295_v0 = vmul.f32 0.5, %v294_v59 }
 0x386   :  { %v291_v61 = vpop.f32.mrf.mxu1 }
 0x387   :  { %1956 = vtanh.f32 %v295_v0 }
 0x388   :  { %v1795_v62 = vpop.f32.mrf.mxu1 }
 0x392   :  { %v1955_v63 = vpop.eup %1954 }
 0x393   :  { %302 = vrot.lane.b32.xlu1 %v1955_v63, %s2046_s7 }
 0x394   :  { %v1957_v1 = vpop.eup %1956 }
 0x395   :  { %v297_v2 = vadd.f32 1.0, %v1957_v1 }
 0x397   :  { %v298_v3 = vmul.f32 0.5, %v297_v2 }
 0x399   :  { %v300_v6 = vmul.f32 %v298_v3, %v233_v50 }
 0x405   :  { %v303_v4 = vpop.permute.xlu1 %302 }
 0x406   :  { %v305_v5 = vmul.f32 %v303_v4, %v298_v3 }
 0x408   :  { %307 = vrot.lane.b32.xlu0 %v305_v5, %s2047_s23 }
 0x47a   :  { %v308_v7 = vpop.permute.xlu0 %307 }
 0x47b   :  { %v310_v8 = vadd.f32 %v308_v7, %v300_v6 }
 0x47d   :  { %1958 = vtanh.f32 %v310_v8 }
 0x48a   :  { %v1959_v9 = vpop.eup %1958 }
 0x48b   :  { %313 = vrot.lane.b32.xlu1 %v1959_v9, %s2046_s7 }
 0x4fd   :  { %v314_v10 = vpop.permute.xlu1 %313 }
 0x4fe   :  { %v2210_v11 = vmul.f32 %v314_v10, %v298_v3 }
 0x500   :  { %v323_v12 = vpack.c.bf16 %v2210_v11, %v2210_v11 }
 0x502   :  { %327 = vrot.lane.b32.xlu0 %v323_v12, %s2047_s23 }
 0x574   :  { %v328_v13 = vpop.permute.xlu0 %327 }
 0x575   :  { %1801 = vmatmul.mubr.msk.bf16.vlgmr.msra.gmra.mxu0 %vm169_vm3, %v328_v13 }
 0x576   :  { %1813 = vmatpush3.bf16.msra.mxu0 %v2140_v15  ;;  %1816 = vmatprep.mubr.msk.bf16.mxu0 %vm2045_vm2, %v2044_v14 }
 0x577   :  { %1814 = vmatprep.subr.bf16.mxu0 %v2044_v14 }
 0x57a   :  { %1815 = vmatpush3.bf16.msra.mxu0 %v2150_v16 }
 0x57b   :  { %1828 = vmatprep.subr.bf16.mxu0 %v2044_v14 }
 0x635   :  { %v366_v17 = vpop.f32.mrf.mxu0 }
 0x636   :  { %v372_v18 = vadd.f32 %v366_v17, %v2176_v22 }
 0x637   :  { %v1802_v19 = vpop.f32.mrf.mxu0 }
 0x638   :  { %1960 = vtanh.f32 %v372_v18  ;;  %v373_v25 = vmul.f32 0.5, %v372_v18 }
 0x639   :  { %v369_v20 = vpop.f32.mrf.mxu0 }
 0x63a   :  { %1962 = vtanh.f32 %v373_v25 }
 0x63b   :  { %v1803_v21 = vpop.f32.mrf.mxu0 }
 0x645   :  { %v1961_v24 = vpop.eup %1960 }
 0x646   :  { %380 = vrot.lane.b32.xlu1 %v1961_v24, %s2046_s7 }
 0x647   :  { %v1963_v27 = vpop.eup %1962 }
 0x648   :  { %v375_v28 = vadd.f32 1.0, %v1963_v27 }
 0x64a   :  { %v376_v31 = vmul.f32 0.5, %v375_v28 }
 0x64c   :  { %v378_v35 = vmul.f32 %v376_v31, %v310_v8 }
 0x6b8   :  { %v381_v32 = vpop.permute.xlu1 %380 }
 0x6b9   :  { %v383_v34 = vmul.f32 %v381_v32, %v376_v31 }
 0x6bb   :  { %385 = vrot.lane.b32.xlu0 %v383_v34, %s2047_s23 }
 0x72d   :  { %v386_v36 = vpop.permute.xlu0 %385 }
 0x72e   :  { %v388_v37 = vadd.f32 %v386_v36, %v378_v35 }
 0x730   :  { %1964 = vtanh.f32 %v388_v37 }
 0x73d   :  { %v1965_v22 = vpop.eup %1964 }
 0x73e   :  { %391 = vrot.lane.b32.xlu1 %v1965_v22, %s2046_s7 }
 0x7b0   :  { %v392_v38 = vpop.permute.xlu1 %391 }
 0x7b1   :  { %v2226_v39 = vmul.f32 %v392_v38, %v376_v31 }
 0x7b3   :  { %v401_v40 = vpack.c.bf16 %v2226_v39, %v2226_v39 }
 0x7b5   :  { %405 = vrot.lane.b32.xlu0 %v401_v40, %s2047_s23 }
 0x827   :  { %v406_v41 = vpop.permute.xlu0 %405 }
 0x828   :  { %1809 = vmatmul.mubr.msk.bf16.vlgmr.msra.gmra.mxu1 %vm169_vm3, %v406_v41 }
 0x829   :  { %1821 = vmatpush3.bf16.msra.mxu1 %v2140_v15  ;;  %1824 = vmatprep.mubr.msk.bf16.mxu1 %vm2045_vm2, %v2044_v14 }
 0x82a   :  { %1822 = vmatprep.subr.bf16.mxu1 %v2044_v14 }
 0x82d   :  { %1823 = vmatpush3.bf16.msra.mxu1 %v2150_v16 }
 0x82e   :  { %1836 = vmatprep.subr.bf16.mxu1 %v2044_v14 }
 0x8e8   :  { %v444_v42 = vpop.f32.mrf.mxu1 }
 0x8e9   :  { %v450_v43 = vadd.f32 %v444_v42, %v2182_v29 }
 0x8ea   :  { %v1810_v44 = vpop.f32.mrf.mxu1 }
 0x8eb   :  { %1966 = vtanh.f32 %v450_v43  ;;  %v451_v48 = vmul.f32 0.5, %v450_v43 }
 0x8ec   :  { %v447_v45 = vpop.f32.mrf.mxu1 }
 0x8ed   :  { %1968 = vtanh.f32 %v451_v48 }
 0x8ee   :  { %v1811_v46 = vpop.f32.mrf.mxu1 }
 0x8f8   :  { %v1967_v47 = vpop.eup %1966 }
 0x8f9   :  { %458 = vrot.lane.b32.xlu1 %v1967_v47, %s2046_s7 }
 0x8fa   :  { %v1969_v49 = vpop.eup %1968 }
 0x8fb   :  { %v453_v50 = vadd.f32 1.0, %v1969_v49 }
 0x8fd   :  { %v454_v51 = vmul.f32 0.5, %v453_v50 }
 0x8ff   :  { %v456_v55 = vmul.f32 %v454_v51, %v388_v37 }
 0x96b   :  { %v459_v52 = vpop.permute.xlu1 %458 }
 0x96c   :  { %v461_v54 = vmul.f32 %v459_v52, %v454_v51 }
 0x96e   :  { %463 = vrot.lane.b32.xlu0 %v461_v54, %s2047_s23 }
 0x9e0   :  { %v464_v56 = vpop.permute.xlu0 %463 }
 0x9e1   :  { %v466_v57 = vadd.f32 %v464_v56, %v456_v55 }
 0x9e3   :  { %1970 = vtanh.f32 %v466_v57 }
 0x9f0   :  { %v1971_v29 = vpop.eup %1970 }
 0x9f1   :  { %469 = vrot.lane.b32.xlu1 %v1971_v29, %s2046_s7 }
 0xa63   :  { %v470_v58 = vpop.permute.xlu1 %469 }
 0xa64   :  { %v2242_v59 = vmul.f32 %v470_v58, %v454_v51 }
 0xa66   :  { %v479_v60 = vpack.c.bf16 %v2242_v59, %v2242_v59 }
 0xa68   :  { %483 = vrot.lane.b32.xlu0 %v479_v60, %s2047_s23 }
 0xada   :  { %v484_v61 = vpop.permute.xlu0 %483 }
 0xadb   :  { %1817 = vmatmul.mubr.msk.bf16.vlgmr.msra.gmra.mxu0 %vm169_vm3, %v484_v61  ;;  %v1942_v61 = vld [vmem:[%s2553_s4 + $0x8] sm:$0xff]  }
 0xadc   :  { %1829 = vmatpush3.bf16.msra.mxu0 %v2140_v15  ;;  %1832 = vmatprep.mubr.msk.bf16.mxu0 %vm2045_vm2, %v2044_v14 }
 0xadd   :  { %1830 = vmatprep.subr.bf16.mxu0 %v2044_v14 }
 0xae0   :  { %1831 = vmatpush3.bf16.msra.mxu0 %v2150_v16 }
 0xae1   :  { %1844 = vmatprep.subr.bf16.mxu0 %v1942_v61 }
 0xb9b   :  { %v522_v62 = vpop.f32.mrf.mxu0 }
 0xb9c   :  { %v528_v63 = vadd.f32 %v522_v62, %v2180_v26 }
 0xb9d   :  { %v1818_v0 = vpop.f32.mrf.mxu0 }
 0xb9e   :  { %1972 = vtanh.f32 %v528_v63  ;;  %v529_v4 = vmul.f32 0.5, %v528_v63 }
 0xb9f   :  { %v525_v1 = vpop.f32.mrf.mxu0 }
 0xba0   :  { %1974 = vtanh.f32 %v529_v4 }
 0xba1   :  { %v1819_v2 = vpop.f32.mrf.mxu0 }
 0xbab   :  { %v1973_v3 = vpop.eup %1972 }
 0xbac   :  { %536 = vrot.lane.b32.xlu1 %v1973_v3, %s2046_s7 }
 0xbad   :  { %v1975_v5 = vpop.eup %1974 }
 0xbae   :  { %v531_v6 = vadd.f32 1.0, %v1975_v5 }
 0xbb0   :  { %v532_v7 = vmul.f32 0.5, %v531_v6 }
 0xbb2   :  { %v534_v10 = vmul.f32 %v532_v7, %v466_v57 }
 0xc1e   :  { %v537_v8 = vpop.permute.xlu1 %536 }
 0xc1f   :  { %v539_v9 = vmul.f32 %v537_v8, %v532_v7  ;;  %v2322_v8 = vld [vmem:[%s2554_s6] sm:$0xff]  }
 0xc21   :  { %541 = vrot.lane.b32.xlu0 %v539_v9, %s2047_s23  ;;  %v1687_v9 = vld [vmem:[%s2552_s2 + $0x8] sm:$0xff] }
 0xc93   :  { %v542_v12 = vpop.permute.xlu0 %541 }
 0xc94   :  { %v544_v13 = vadd.f32 %v542_v12, %v534_v10  ;;  %v1686_v12 = vld [vmem:[%s2550_s1 + $0x8] sm:$0xff] }
 0xc96   :  { %1976 = vtanh.f32 %v544_v13 }
 0xca3   :  { %v1977_v26 = vpop.eup %1976 }
 0xca4   :  { %547 = vrot.lane.b32.xlu1 %v1977_v26, %s2046_s7 }
 0xd16   :  { %v548_v17 = vpop.permute.xlu1 %547 }
 0xd17   :  { %v2257_v18 = vmul.f32 %v548_v17, %v532_v7  ;;  %v2314_v7 = vld [vmem:[%s2554_s6 + $0x8] sm:$0xff]  }
 0xd19   :  { %v557_v19 = vpack.c.bf16 %v2257_v18, %v2257_v18 }
 0xd1b   :  { %561 = vrot.lane.b32.xlu0 %v557_v19, %s2047_s23 }
 0xd8d   :  { %v562_v20 = vpop.permute.xlu0 %561 }
 0xd8e   :  { %1825 = vmatmul.mubr.msk.bf16.vlgmr.msra.gmra.mxu1 %vm169_vm3, %v562_v20 }
 0xd8f   :  { %1837 = vmatpush3.bf16.msra.mxu1 %v2140_v15  ;;  %1840 = vmatprep.mubr.msk.bf16.mxu1 %vm2045_vm2, %v2044_v14 }
 0xd90   :  { %1838 = vmatprep.subr.bf16.mxu1 %v2044_v14 }
 0xd93   :  { %1839 = vmatpush3.bf16.msra.mxu1 %v2150_v16 }
 0xd94   :  { %1856 = vmatprep.subr.bf16.mxu1 %v2044_v14 }
 0xe4e   :  { %v600_v21 = vpop.f32.mrf.mxu1 }
 0xe4f   :  { %v606_v24 = vadd.f32 %v600_v21, %v2186_v33 }
 0xe50   :  { %v1826_v25 = vpop.f32.mrf.mxu1 }
 0xe51   :  { %1978 = vtanh.f32 %v606_v24  ;;  %v607_v15 = vmul.f32 0.5, %v606_v24  ;;  %v2353_v25 = vld [vmem:[%s2555_s8] ss:$0 sm:$0xff] }
 0xe52   :  { %v603_v27 = vpop.f32.mrf.mxu1 }
 0xe53   :  { %1980 = vtanh.f32 %v607_v15 }
 0xe54   :  { %v1827_v28 = vpop.f32.mrf.mxu1 }
 0xe5e   :  { %v1979_v31 = vpop.eup %1978 }
 0xe5f   :  { %614 = vrot.lane.b32.xlu1 %v1979_v31, %s2046_s7 }
 0xe60   :  { %v1981_v32 = vpop.eup %1980 }
 0xe61   :  { %v609_v34 = vadd.f32 1.0, %v1981_v32 }
 0xe63   :  { %v610_v35 = vmul.f32 0.5, %v609_v34 }
 0xe65   :  { %v612_v16 = vmul.f32 %v610_v35, %v544_v13  ;;  %v917_v13 = vpack.c.bf16 %v1686_v12, %v1686_v12 }
 0xed1   :  { %v615_v36 = vpop.permute.xlu1 %614 }
 0xed2   :  { %v617_v37 = vmul.f32 %v615_v36, %v610_v35 }
 0xed4   :  { %619 = vrot.lane.b32.xlu0 %v617_v37, %s2047_s23 }
 0xf46   :  { %v620_v22 = vpop.permute.xlu0 %619 }
 0xf47   :  { %v622_v38 = vadd.f32 %v620_v22, %v612_v16 }
 0xf49   :  { %1982 = vtanh.f32 %v622_v38 }
 0xf56   :  { %v1983_v33 = vpop.eup %1982 }
 0xf57   :  { %625 = vrot.lane.b32.xlu1 %v1983_v33, %s2046_s7 }
 0xfc9   :  { %v626_v40 = vpop.permute.xlu1 %625 }
 0xfca   :  { %v2273_v41 = vmul.f32 %v626_v40, %v610_v35 }
 0xfcc   :  { %v635_v42 = vpack.c.bf16 %v2273_v41, %v2273_v41 }
 0xfce   :  { %639 = vrot.lane.b32.xlu0 %v635_v42, %s2047_s23 }
0x1040   :  { %v640_v43 = vpop.permute.xlu0 %639 }
0x1041   :  { %1833 = vmatmul.mubr.msk.bf16.vlgmr.msra.gmra.mxu0 %vm169_vm3, %v640_v43 }
0x1042   :  { %1845 = vmatpush3.bf16.msra.mxu0 %v1942_v61 }
0x1101   :  { %v678_v44 = vpop.f32.mrf.mxu0 }
0x1102   :  { %v684_v45 = vadd.f32 %v678_v44, %v2178_v23 }
0x1103   :  { %v1834_v46 = vpop.f32.mrf.mxu0 }
0x1104   :  { %1984 = vtanh.f32 %v684_v45  ;;  %v685_v50 = vmul.f32 0.5, %v684_v45 }
0x1105   :  { %v681_v47 = vpop.f32.mrf.mxu0 }
0x1106   :  { %1986 = vtanh.f32 %v685_v50 }
0x1107   :  { %v1835_v48 = vpop.f32.mrf.mxu0 }
0x1111   :  { %v1985_v49 = vpop.eup %1984 }
0x1112   :  { %692 = vrot.lane.b32.xlu1 %v1985_v49, %s2046_s7 }
0x1113   :  { %v1987_v51 = vpop.eup %1986 }
0x1114   :  { %v687_v52 = vadd.f32 1.0, %v1987_v51 }
0x1116   :  { %v688_v54 = vmul.f32 0.5, %v687_v52 }
0x1118   :  { %v690_v23 = vmul.f32 %v688_v54, %v622_v38 }
0x1184   :  { %v693_v55 = vpop.permute.xlu1 %692 }
0x1185   :  { %v695_v56 = vmul.f32 %v693_v55, %v688_v54 }
0x1187   :  { %697 = vrot.lane.b32.xlu0 %v695_v56, %s2047_s23 }
0x118b   :  { %241 = vrot.lane.b32.xlu0 %v2195_v53, %s2047_s23  ;;  %v1943_v53 = vld [vmem:[%s2553_s4] sm:$0xff]  }
0x118c   :  { %1846 = vmatprep.subr.bf16.mxu0 %v1943_v53 }
0x118d   :  { %1847 = vmatpush3.bf16.msra.mxu0 %v1943_v53 }
0x118e   :  { %1872 = vmatprep.subr.bf16.mxu0 %v2044_v14 }
0x118f   :  { %396 = vrot.lane.b32.xlu0 %v2226_v39, %s2047_s23 }
0x11f9   :  { %v698_v57 = vpop.permute.xlu0 %697 }
0x11fa   :  { %v2286_v29 = vadd.f32 %v698_v57, %v690_v23 }
0x11fc   :  { %1988 = vtanh.f32 %v2286_v29 }
0x11fd   :  { %v242_v58 = vpop.permute.xlu0 %241 }
0x11fe   :  { %244 = vst.msk [vmem:[#allocation3] sm:$0xff] %vm169_vm3, %v242_v58 }
0x1201   :  { %v397_v60 = vpop.permute.xlu0 %396 }
0x1202   :  { %400 = vst.msk [vmem:[#allocation3 + $0x10] sm:$0xff] %vm169_vm3, %v397_v60 }
0x1205   :  { %v791_v3 = vld [vmem:[#allocation3] sm:$0xff] }
0x1209   :  { %v1989_v39 = vpop.eup %1988 }
0x120a   :  { %703 = vrot.lane.b32.xlu1 %v1989_v39, %s2046_s7 }
0x120e   :  { %318 = vrot.lane.b32.xlu1 %v2210_v11, %s2047_s23 }
0x1212   :  { %474 = vrot.lane.b32.xlu1 %v2242_v59, %s2047_s23  ;;  %v793_v59 = vld [vmem:[#allocation3 + $0x10] sm:$0xff] }
0x127c   :  { %v704_v62 = vpop.permute.xlu1 %703 }
0x127d   :  { %v2303_v63 = vmul.f32 %v704_v62, %v688_v54 }
0x127f   :  { %v713_v0 = vpack.c.bf16 %v2303_v63, %v2303_v63 }
0x1280   :  { %v319_v1 = vpop.permute.xlu1 %318 }
0x1281   :  { %322 = vst.msk [vmem:[#allocation3 + $0x8] sm:$0xff] %vm169_vm3, %v319_v1  ;;  %717 = vrot.lane.b32.xlu0 %v713_v0, %s2047_s23 }
0x1284   :  { %v475_v2 = vpop.permute.xlu1 %474 }
0x1285   :  { %478 = vst.msk [vmem:[#allocation3 + $0x18] sm:$0xff] %vm169_vm3, %v475_v2  ;;  %983 = vrot.lane.b32.xlu0 %v1687_v9, %s2047_s23 }
0x1288   :  { %v792_v4 = vld [vmem:[#allocation3 + $0x8] sm:$0xff] }
0x1289   :  { %v799_v11 = vpack.c.bf16 %v792_v4, %v791_v3 }
0x128b   :  { %1848 = vmatprep.mubr.msk.bf16.mxu0 %vm169_vm3, %v799_v11 }
0x128c   :  { %v794_v5 = vld [vmem:[#allocation3 + $0x18] sm:$0xff] }
0x128d   :  { %v800_v6 = vpack.c.bf16 %v794_v5, %v793_v59 }
0x128f   :  { %1849 = vmatmul.mubr.msk.bf16.vlgmr.msra.gmra.mxu0 %vm169_vm3, %v800_v6 }
0x1290   :  { %1873 = vmatpush3.bf16.msra.mxu0 %v2314_v7 }
0x1291   :  { %1874 = vmatprep.subr.bf16.mxu0 %v2044_v14 }
0x1294   :  { %1875 = vmatpush3.bf16.msra.mxu0 %v2322_v8 }
0x1295   :  { %1888 = vmatprep.subr.bf16.mxu0 %v2044_v14 }
0x12f3   :  { %v718_v10 = vpop.permute.xlu0 %717 }
0x12f4   :  { %1841 = vmatmul.mubr.msk.bf16.vlgmr.msra.gmra.mxu1 %vm169_vm3, %v718_v10 }
0x12f5   :  { %1857 = vmatpush3.bf16.msra.mxu1 %v2314_v7  ;;  %1860 = vmatprep.mubr.msk.bf16.mxu1 %vm2045_vm2, %v2044_v14 }
0x12f6   :  { %1858 = vmatprep.subr.bf16.mxu1 %v2044_v14 }
0x12f7   :  { %v984_v40 = vpop.permute.xlu0 %983 }
0x12f9   :  { %1859 = vmatpush3.bf16.msra.mxu1 %v2322_v8 }
0x12fa   :  { %1864 = vmatprep.subr.bf16.mxu1 %v2044_v14 }
0x12fc   :  { %1861 = vmatmul.mubr.msk.bf16.vlgmr.msra.gmra.mxu1 %vm169_vm3, %v917_v13 }
0x12fd   :  { %1865 = vmatpush3.bf16.msra.mxu1 %v2314_v7  ;;  %1868 = vmatprep.mubr.msk.bf16.mxu1 %vm2045_vm2, %v2044_v14 }
0x12fe   :  { %1866 = vmatprep.subr.bf16.mxu1 %v2044_v14 }
0x1301   :  { %1867 = vmatpush3.bf16.msra.mxu1 %v2322_v8 }
0x1302   :  { %1880 = vmatprep.subr.bf16.mxu1 %v2044_v14 }
0x134f   :  { %v2347_v26 = vpop.f32.mrf.mxu0 }
0x1351   :  { %v872_v21 = vpop.f32.mrf.mxu0 }
0x1352   :  { %v873_v28 = vadd.f32 %v2353_v25, %v872_v21 }
0x1353   :  { %v2381_v62 = vpop.f32.mrf.mxu0 }
0x1355   :  { %v875_v0 = vpop.f32.mrf.mxu0 }
0x1356   :  { %v876_v1 = vadd.f32 %v2353_v25, %v875_v0 }
0x13b4   :  { %v756_v17 = vpop.f32.mrf.mxu1 }
0x13b5   :  { %v762_v19 = vadd.f32 %v756_v17, %v2184_v30 }
0x13b6   :  { %v1842_v20 = vpop.f32.mrf.mxu1 }
0x13b7   :  { %v763_v47 = vmul.f32 0.5, %v762_v19 }
0x13b8   :  { %v759_v24 = vpop.f32.mrf.mxu1 }
0x13ba   :  { %v1843_v27 = vpop.f32.mrf.mxu1 }
0x13bc   :  { %v970_v31 = vpop.f32.mrf.mxu1 }
0x13bd   :  { %v976_v15 = vadd.f32 %v970_v31, %v873_v28 }
0x13be   :  { %v1862_v32 = vpop.f32.mrf.mxu1 }
0x13bf   :  { %1990 = vtanh.f32 %v976_v15  ;;  %v977_v30 = vmul.f32 0.5, %v976_v15 }
0x13c0   :  { %v973_v34 = vpop.f32.mrf.mxu1 }
0x13c1   :  { %1992 = vtanh.f32 %v977_v30 }
0x13c2   :  { %v1863_v35 = vpop.f32.mrf.mxu1 }
0x13cc   :  { %v1991_v36 = vpop.eup %1990 }
0x13cd   :  { %988 = vrot.lane.b32.xlu1 %v1991_v36, %s2046_s7 }
0x13ce   :  { %v1993_v37 = vpop.eup %1992 }
0x13cf   :  { %v979_v16 = vadd.f32 1.0, %v1993_v37 }
0x13d1   :  { %v980_v22 = vmul.f32 0.5, %v979_v16 }
0x13d3   :  { %v986_v42 = vmul.f32 %v984_v40, %v980_v22  ;;  %v881_v40 = vadd.f32 %v2347_v26, %v2353_v25 }
0x143f   :  { %v989_v38 = vpop.permute.xlu1 %988 }
0x1440   :  { %v991_v33 = vmul.f32 %v989_v38, %v980_v22 }
0x1442   :  { %993 = vrot.lane.b32.xlu1 %v991_v33, %s2047_s23 }
0x14b4   :  { %v994_v43 = vpop.permute.xlu1 %993 }
0x14b5   :  { %v996_v44 = vadd.f32 %v994_v43, %v986_v42 }
0x14b7   :  { %1994 = vtanh.f32 %v996_v44 }
0x14b8   :  { %1996 = vtanh.f32 %v762_v19 }
0x14b9   :  { %1998 = vtanh.f32 %v763_v47 }
0x14c4   :  { %v1995_v45 = vpop.eup %1994 }
0x14c5   :  { %999 = vrot.lane.b32.xlu0 %v1995_v45, %s2046_s7  ;;  %v1997_v46 = vpop.eup %1996 }
0x14c6   :  { %v1999_v48 = vpop.eup %1998 }
0x14c7   :  { %v765_v49 = vadd.f32 1.0, %v1999_v48 }
0x14c9   :  { %770 = vrot.lane.b32.xlu0 %v1997_v46, %s2046_s7  ;;  %v766_v54 = vmul.f32 0.5, %v765_v49 }
0x14cb   :  { %v768_v57 = vmul.f32 %v766_v54, %v2286_v29 }
0x1537   :  { %v1000_v50 = vpop.permute.xlu0 %999 }
0x1538   :  { %v2360_v51 = vmul.f32 %v1000_v50, %v980_v22 }
0x153a   :  { %v1008_v52 = vpack.c.bf16 %v2360_v51, %v2360_v51 }
0x153b   :  { %v771_v55 = vpop.permute.xlu0 %770 }
0x153c   :  { %v773_v56 = vmul.f32 %v771_v55, %v766_v54  ;;  %1011 = vrot.lane.b32.xlu1 %v1008_v52, %s2047_s23 }
0x153e   :  { %775 = vrot.lane.b32.xlu0 %v773_v56, %s2047_s23 }
0x15ae   :  { %v1012_v23 = vpop.permute.xlu1 %1011 }
0x15af   :  { %1869 = vmatmul.mubr.msk.bf16.vlgmr.msra.gmra.mxu1 %vm169_vm3, %v1012_v23 }
0x15b0   :  { %v776_v58 = vpop.permute.xlu0 %775  ;;  %1881 = vmatpush3.bf16.msra.mxu1 %v2314_v7  ;;  %1884 = vmatprep.mubr.msk.bf16.mxu1 %vm2045_vm2, %v2044_v14 }
0x15b1   :  { %v778_v60 = vadd.f32 %v776_v58, %v768_v57  ;;  %1882 = vmatprep.subr.bf16.mxu1 %v2044_v14 }
0x15b3   :  { %2000 = vtanh.f32 %v778_v60 }
0x15b4   :  { %1883 = vmatpush3.bf16.msra.mxu1 %v2322_v8 }
0x15b5   :  { %1896 = vmatprep.subr.bf16.mxu1 %v2044_v14 }
0x15c0   :  { %v2001_v61 = vpop.eup %2000 }
0x15c1   :  { %781 = vrot.lane.b32.xlu0 %v2001_v61, %s2046_s7 }
0x15c5   :  { %552 = vrot.lane.b32.xlu0 %v2257_v18, %s2047_s23 }
0x15c9   :  { %708 = vrot.lane.b32.xlu0 %v2303_v63, %s2047_s23 }
0x1633   :  { %v782_v29 = vpop.permute.xlu0 %781 }
0x1634   :  { %v784_v21 = vmul.f32 %v782_v29, %v766_v54 }
0x1637   :  { %v553_v53 = vpop.permute.xlu0 %552 }
0x1638   :  { %556 = vst.msk [vmem:[#allocation3 + $0x20] sm:$0xff] %vm169_vm3, %v553_v53  ;;  %v884_v53 = vadd.f32 %v2381_v62, %v2353_v25 }
0x163b   :  { %v709_v39 = vpop.permute.xlu0 %708 }
0x163c   :  { %712 = vst.msk [vmem:[#allocation3 + $0x30] sm:$0xff] %vm169_vm3, %v709_v39 }
0x163f   :  { %v795_v32 = vld [vmem:[#allocation3 + $0x20] sm:$0xff] }
0x1643   :  { %v797_v35 = vld [vmem:[#allocation3 + $0x30] sm:$0xff] }
0x166f   :  { %v1050_v2 = vpop.f32.mrf.mxu1 }
0x1670   :  { %v1056_v3 = vadd.f32 %v1050_v2, %v876_v1 }
0x1671   :  { %v1870_v4 = vpop.f32.mrf.mxu1 }
0x1672   :  { %2002 = vtanh.f32 %v1056_v3  ;;  %v1057_v63 = vmul.f32 0.5, %v1056_v3 }
0x1673   :  { %v1053_v18 = vpop.f32.mrf.mxu1 }
0x1674   :  { %2004 = vtanh.f32 %v1057_v63 }
0x1675   :  { %v1871_v11 = vpop.f32.mrf.mxu1 }
0x167f   :  { %v2003_v59 = vpop.eup %2002 }
0x1680   :  { %1064 = vrot.lane.b32.xlu1 %v2003_v59, %s2046_s7 }
0x1681   :  { %v2005_v5 = vpop.eup %2004 }
0x1682   :  { %v1059_v6 = vadd.f32 1.0, %v2005_v5 }
0x1684   :  { %v1060_v9 = vmul.f32 0.5, %v1059_v6 }
0x1686   :  { %v1062_v13 = vmul.f32 %v1060_v9, %v996_v44 }
0x16f2   :  { %v1065_v10 = vpop.permute.xlu1 %1064 }
0x16f3   :  { %v1067_v12 = vmul.f32 %v1065_v10, %v1060_v9 }
0x16f5   :  { %1069 = vrot.lane.b32.xlu1 %v1067_v12, %s2047_s23 }
0x1767   :  { %v1070_v17 = vpop.permute.xlu1 %1069 }
0x1768   :  { %v1072_v19 = vadd.f32 %v1070_v17, %v1062_v13 }
0x176a   :  { %2006 = vtanh.f32 %v1072_v19 }
0x1777   :  { %v2007_v20 = vpop.eup %2006 }
0x1778   :  { %1075 = vrot.lane.b32.xlu1 %v2007_v20, %s2046_s7 }
0x177c   :  { %630 = vrot.lane.b32.xlu1 %v2273_v41, %s2047_s23 }
0x1780   :  { %786 = vrot.lane.b32.xlu1 %v784_v21, %s2047_s23 }
0x17ea   :  { %v1076_v24 = vpop.permute.xlu1 %1075 }
0x17eb   :  { %v2390_v27 = vmul.f32 %v1076_v24, %v1060_v9 }
0x17ed   :  { %v1084_v28 = vpack.c.bf16 %v2390_v27, %v2390_v27 }
0x17ee   :  { %v631_v31 = vpop.permute.xlu1 %630 }
0x17ef   :  { %634 = vst.msk [vmem:[#allocation3 + $0x28] sm:$0xff] %vm169_vm3, %v631_v31  ;;  %1087 = vrot.lane.b32.xlu0 %v1084_v28, %s2047_s23 }
0x17f2   :  { %v787_v15 = vpop.permute.xlu1 %786 }
0x17f3   :  { %790 = vst.msk [vmem:[#allocation3 + $0x38] sm:$0xff] %vm169_vm3, %v787_v15 }
0x17f6   :  { %v796_v34 = vld [vmem:[#allocation3 + $0x28] sm:$0xff] }
0x17f7   :  { %v801_v41 = vpack.c.bf16 %v796_v34, %v795_v32 }
0x17f9   :  { %1852 = vmatprep.mubr.msk.bf16.mxu0 %vm169_vm3, %v801_v41 }
0x17fa   :  { %v798_v36 = vld [vmem:[#allocation3 + $0x38] sm:$0xff] }
0x17fb   :  { %v802_v30 = vpack.c.bf16 %v798_v36, %v797_v35 }
0x17fd   :  { %1853 = vmatmul.mubr.msk.bf16.gmra.mxu0 %vm169_vm3, %v802_v30 }
0x17fe   :  { %1876 = vmatprep.mubr.msk.bf16.mxu0 %vm2045_vm2, %v2044_v14 }
0x1861   :  { %v1088_v37 = vpop.permute.xlu0 %1087 }
0x1862   :  { %1877 = vmatmul.mubr.msk.bf16.vlgmr.msra.gmra.mxu0 %vm169_vm3, %v1088_v37 }
0x1863   :  { %1889 = vmatpush3.bf16.msra.mxu0 %v2314_v7  ;;  %1892 = vmatprep.mubr.msk.bf16.mxu0 %vm2045_vm2, %v2044_v14 }
0x1864   :  { %1890 = vmatprep.subr.bf16.mxu0 %v2044_v14 }
0x1867   :  { %1891 = vmatpush3.bf16.msra.mxu0 %v2322_v8 }
0x1868   :  { %1904 = vmatprep.subr.bf16.mxu0 %v2044_v14 }
0x18bd   :  { %v2408_v16 = vpop.f32.mrf.mxu0 }
0x18bf   :  { %v2410_v22 = vpop.f32.mrf.mxu0 }
0x18c0   :  { %v889_v21 = vadd.f32 %v2353_v25, %v2410_v22 }
0x18c1   :  { %v2412_v38 = vpop.f32.mrf.mxu0 }
0x18c3   :  { %v2414_v33 = vpop.f32.mrf.mxu0 }
0x1922   :  { %v1126_v42 = vpop.f32.mrf.mxu0 }
0x1923   :  { %v1132_v43 = vadd.f32 %v1126_v42, %v881_v40 }
0x1924   :  { %v1878_v44 = vpop.f32.mrf.mxu0 }
0x1925   :  { %2008 = vtanh.f32 %v1132_v43  ;;  %v1133_v48 = vmul.f32 0.5, %v1132_v43 }
0x1926   :  { %v1129_v45 = vpop.f32.mrf.mxu0 }
0x1927   :  { %2010 = vtanh.f32 %v1133_v48 }
0x1928   :  { %v1879_v46 = vpop.f32.mrf.mxu0 }
0x1932   :  { %v2009_v47 = vpop.eup %2008 }
0x1933   :  { %1140 = vrot.lane.b32.xlu1 %v2009_v47, %s2046_s7 }
0x1934   :  { %v2011_v49 = vpop.eup %2010 }
0x1935   :  { %v1135_v50 = vadd.f32 1.0, %v2011_v49  ;;  %v892_v49 = vadd.f32 %v2353_v25, %v2414_v33 }
0x1937   :  { %v1136_v52 = vmul.f32 0.5, %v1135_v50 }
0x1939   :  { %v1138_v56 = vmul.f32 %v1136_v52, %v1072_v19 }
0x19a5   :  { %v1141_v54 = vpop.permute.xlu1 %1140 }
0x19a6   :  { %v1143_v55 = vmul.f32 %v1141_v54, %v1136_v52 }
0x19a8   :  { %1145 = vrot.lane.b32.xlu0 %v1143_v55, %s2047_s23 }
0x1a1a   :  { %v1146_v26 = vpop.permute.xlu0 %1145 }
0x1a1b   :  { %v1148_v23 = vadd.f32 %v1146_v26, %v1138_v56 }
0x1a1d   :  { %2012 = vtanh.f32 %v1148_v23 }
0x1a2a   :  { %v2013_v57 = vpop.eup %2012 }
0x1a2b   :  { %1151 = vrot.lane.b32.xlu1 %v2013_v57, %s2046_s7 }
0x1a9d   :  { %v1152_v58 = vpop.permute.xlu1 %1151 }
0x1a9e   :  { %v2421_v60 = vmul.f32 %v1152_v58, %v1136_v52 }
0x1aa0   :  { %v1160_v61 = vpack.c.bf16 %v2421_v60, %v2421_v60 }
0x1aa2   :  { %1163 = vrot.lane.b32.xlu0 %v1160_v61, %s2047_s23 }
0x1b14   :  { %v1164_v29 = vpop.permute.xlu0 %1163 }
0x1b15   :  { %1885 = vmatmul.mubr.msk.bf16.vlgmr.msra.gmra.mxu1 %vm169_vm3, %v1164_v29 }
0x1b16   :  { %1897 = vmatpush3.bf16.msra.mxu1 %v2314_v7  ;;  %1900 = vmatprep.mubr.msk.bf16.mxu1 %vm2045_vm2, %v2044_v14 }
0x1b17   :  { %1898 = vmatprep.subr.bf16.mxu1 %v2044_v14 }
0x1b1a   :  { %1899 = vmatpush3.bf16.msra.mxu1 %v2322_v8 }
0x1b1b   :  { %1912 = vmatprep.subr.bf16.mxu1 %v2044_v14 }
0x1bd5   :  { %v1202_v39 = vpop.f32.mrf.mxu1 }
0x1bd6   :  { %v1208_v0 = vadd.f32 %v1202_v39, %v884_v53 }
0x1bd7   :  { %v1886_v1 = vpop.f32.mrf.mxu1 }
0x1bd8   :  { %2014 = vtanh.f32 %v1208_v0  ;;  %v1209_v18 = vmul.f32 0.5, %v1208_v0 }
0x1bd9   :  { %v1205_v2 = vpop.f32.mrf.mxu1 }
0x1bda   :  { %2016 = vtanh.f32 %v1209_v18 }
0x1bdb   :  { %v1887_v3 = vpop.f32.mrf.mxu1 }
0x1bdc   :  { %v897_v3 = vadd.f32 %v2408_v16, %v2353_v25 }
0x1be5   :  { %v2015_v4 = vpop.eup %2014 }
0x1be6   :  { %1216 = vrot.lane.b32.xlu1 %v2015_v4, %s2046_s7 }
0x1be7   :  { %v2017_v11 = vpop.eup %2016 }
0x1be8   :  { %v1211_v59 = vadd.f32 1.0, %v2017_v11 }
0x1bea   :  { %v1212_v63 = vmul.f32 0.5, %v1211_v59 }
0x1bec   :  { %v1214_v9 = vmul.f32 %v1212_v63, %v1148_v23 }
0x1c58   :  { %v1217_v5 = vpop.permute.xlu1 %1216 }
0x1c59   :  { %v1219_v6 = vmul.f32 %v1217_v5, %v1212_v63 }
0x1c5b   :  { %1221 = vrot.lane.b32.xlu0 %v1219_v6, %s2047_s23 }
0x1ccd   :  { %v1222_v62 = vpop.permute.xlu0 %1221 }
0x1cce   :  { %v1224_v10 = vadd.f32 %v1222_v62, %v1214_v9 }
0x1cd0   :  { %2018 = vtanh.f32 %v1224_v10 }
0x1cdd   :  { %v2019_v12 = vpop.eup %2018 }
0x1cde   :  { %1227 = vrot.lane.b32.xlu1 %v2019_v12, %s2046_s7 }
0x1d50   :  { %v1228_v13 = vpop.permute.xlu1 %1227 }
0x1d51   :  { %v2438_v17 = vmul.f32 %v1228_v13, %v1212_v63 }
0x1d53   :  { %v1236_v19 = vpack.c.bf16 %v2438_v17, %v2438_v17 }
0x1d55   :  { %1239 = vrot.lane.b32.xlu0 %v1236_v19, %s2047_s23 }
0x1dc7   :  { %v1240_v20 = vpop.permute.xlu0 %1239 }
0x1dc8   :  { %1893 = vmatmul.mubr.msk.bf16.vlgmr.msra.gmra.mxu0 %vm169_vm3, %v1240_v20 }
0x1dc9   :  { %1905 = vmatpush3.bf16.msra.mxu0 %v2314_v7  ;;  %1908 = vmatprep.mubr.msk.bf16.mxu0 %vm2045_vm2, %v2044_v14 }
0x1dca   :  { %1906 = vmatprep.subr.bf16.mxu0 %v2044_v14 }
0x1dcd   :  { %1907 = vmatpush3.bf16.msra.mxu0 %v2322_v8 }
0x1e88   :  { %v1278_v24 = vpop.f32.mrf.mxu0 }
0x1e89   :  { %v1284_v28 = vadd.f32 %v1278_v24, %v889_v21 }
0x1e8a   :  { %v1894_v31 = vpop.f32.mrf.mxu0 }
0x1e8b   :  { %2020 = vtanh.f32 %v1284_v28  ;;  %v1285_v41 = vmul.f32 0.5, %v1284_v28 }
0x1e8c   :  { %v1281_v15 = vpop.f32.mrf.mxu0 }
0x1e8d   :  { %2022 = vtanh.f32 %v1285_v41 }
0x1e8e   :  { %v1895_v32 = vpop.f32.mrf.mxu0 }
0x1e8f   :  { %v900_v32 = vadd.f32 %v2412_v38, %v2353_v25 }
0x1e98   :  { %v2021_v34 = vpop.eup %2020 }
0x1e99   :  { %1292 = vrot.lane.b32.xlu1 %v2021_v34, %s2046_s7 }
0x1e9a   :  { %v2023_v35 = vpop.eup %2022 }
0x1e9b   :  { %v1287_v36 = vadd.f32 1.0, %v2023_v35 }
0x1e9d   :  { %v1288_v30 = vmul.f32 0.5, %v1287_v36 }
0x1e9f   :  { %v1290_v42 = vmul.f32 %v1288_v30, %v1224_v10 }
0x1f0b   :  { %v1293_v37 = vpop.permute.xlu1 %1292 }
0x1f0c   :  { %v1295_v40 = vmul.f32 %v1293_v37, %v1288_v30 }
0x1f0e   :  { %1297 = vrot.lane.b32.xlu0 %v1295_v40, %s2047_s23 }
0x1f80   :  { %v1298_v22 = vpop.permute.xlu0 %1297 }
0x1f81   :  { %v1300_v43 = vadd.f32 %v1298_v22, %v1290_v42 }
0x1f83   :  { %2024 = vtanh.f32 %v1300_v43 }
0x1f90   :  { %v2025_v44 = vpop.eup %2024 }
0x1f91   :  { %1303 = vrot.lane.b32.xlu1 %v2025_v44, %s2046_s7 }
0x2003   :  { %v1304_v45 = vpop.permute.xlu1 %1303 }
0x2004   :  { %v2454_v46 = vmul.f32 %v1304_v45, %v1288_v30 }
0x2006   :  { %v1312_v47 = vpack.c.bf16 %v2454_v46, %v2454_v46 }
0x2008   :  { %1315 = vrot.lane.b32.xlu0 %v1312_v47, %s2047_s23 }
0x207a   :  { %v1316_v48 = vpop.permute.xlu0 %1315 }
0x207b   :  { %1901 = vmatmul.mubr.msk.bf16.vlgmr.msra.gmra.mxu1 %vm169_vm3, %v1316_v48 }
0x207c   :  { %1913 = vmatpush3.bf16.msra.mxu1 %v2314_v7  ;;  %1916 = vmatprep.mubr.msk.bf16.mxu1 %vm2045_vm2, %v2044_v14 }
0x207d   :  { %1914 = vmatprep.subr.bf16.mxu1 %v2044_v14 }
0x2080   :  { %1915 = vmatpush3.bf16.msra.mxu1 %v2322_v8 }
0x213b   :  { %v1354_v50 = vpop.f32.mrf.mxu1 }
0x213c   :  { %v1360_v52 = vadd.f32 %v1354_v50, %v892_v49 }
0x213d   :  { %v1902_v54 = vpop.f32.mrf.mxu1 }
0x213e   :  { %2026 = vtanh.f32 %v1360_v52  ;;  %v1361_v7 = vmul.f32 0.5, %v1360_v52  ;;  %v1947_v52 = vld [vmem:[%s2556_s9] sm:$0xff]  }
0x213f   :  { %v1357_v55 = vpop.f32.mrf.mxu1 }
0x2140   :  { %2028 = vtanh.f32 %v1361_v7 }
0x2141   :  { %v1903_v56 = vpop.f32.mrf.mxu1 }
0x214b   :  { %v2027_v26 = vpop.eup %2026 }
0x214c   :  { %1368 = vrot.lane.b32.xlu1 %v2027_v26, %s2046_s7 }
0x214d   :  { %v2029_v23 = vpop.eup %2028 }
0x214e   :  { %v1363_v57 = vadd.f32 1.0, %v2029_v23 }
0x2150   :  { %v1364_v58 = vmul.f32 0.5, %v1363_v57 }
0x2152   :  { %v1366_v8 = vmul.f32 %v1364_v58, %v1300_v43 }
0x21be   :  { %v1369_v14 = vpop.permute.xlu1 %1368 }
0x21bf   :  { %v1371_v61 = vmul.f32 %v1369_v14, %v1364_v58 }
0x21c1   :  { %1373 = vrot.lane.b32.xlu0 %v1371_v61, %s2047_s23 }
0x2233   :  { %v1374_v33 = vpop.permute.xlu0 %1373 }
0x2234   :  { %v1376_v29 = vadd.f32 %v1374_v33, %v1366_v8 }
0x2236   :  { %2030 = vtanh.f32 %v1376_v29 }
0x2243   :  { %v2031_v53 = vpop.eup %2030 }
0x2244   :  { %1379 = vrot.lane.b32.xlu1 %v2031_v53, %s2046_s7 }
0x22b6   :  { %v1380_v39 = vpop.permute.xlu1 %1379 }
0x22b7   :  { %v2470_v0 = vmul.f32 %v1380_v39, %v1364_v58 }
0x22b9   :  { %v1388_v1 = vpack.c.bf16 %v2470_v0, %v2470_v0 }
0x22bb   :  { %1391 = vrot.lane.b32.xlu0 %v1388_v1, %s2047_s23  ;;  %v1698_v1 = vld [vmem:[%s2557_s10] ss:$0 sm:$0xff] }
0x232d   :  { %v1392_v2 = vpop.permute.xlu0 %1391 }
0x232e   :  { %1909 = vmatmul.mubr.msk.bf16.vlgmr.msra.gmra.mxu0 %vm169_vm3, %v1392_v2 }
0x23ee   :  { %v1430_v4 = vpop.f32.mrf.mxu0 }
0x23ef   :  { %v1436_v18 = vadd.f32 %v1430_v4, %v897_v3 }
0x23f0   :  { %v1910_v11 = vpop.f32.mrf.mxu0 }
0x23f1   :  { %2032 = vtanh.f32 %v1436_v18  ;;  %v1437_v6 = vmul.f32 0.5, %v1436_v18 }
0x23f2   :  { %v1433_v59 = vpop.f32.mrf.mxu0 }
0x23f3   :  { %2034 = vtanh.f32 %v1437_v6 }
0x23f4   :  { %v1911_v63 = vpop.f32.mrf.mxu0 }
0x23fe   :  { %v2033_v5 = vpop.eup %2032 }
0x23ff   :  { %1444 = vrot.lane.b32.xlu1 %v2033_v5, %s2046_s7 }
0x2400   :  { %v2035_v9 = vpop.eup %2034 }
0x2401   :  { %v1439_v62 = vadd.f32 1.0, %v2035_v9 }
0x2403   :  { %v1440_v10 = vmul.f32 0.5, %v1439_v62 }
0x2405   :  { %v1442_v19 = vmul.f32 %v1440_v10, %v1376_v29 }
0x2471   :  { %v1445_v12 = vpop.permute.xlu1 %1444 }
0x2472   :  { %v1447_v13 = vmul.f32 %v1445_v12, %v1440_v10 }
0x2474   :  { %1449 = vrot.lane.b32.xlu0 %v1447_v13, %s2047_s23 }
0x24e6   :  { %v1450_v16 = vpop.permute.xlu0 %1449 }
0x24e7   :  { %v1452_v20 = vadd.f32 %v1450_v16, %v1442_v19 }
0x24e9   :  { %2036 = vtanh.f32 %v1452_v20 }
0x24f6   :  { %v2037_v21 = vpop.eup %2036 }
0x24f7   :  { %1455 = vrot.lane.b32.xlu1 %v2037_v21, %s2046_s7 }
0x2569   :  { %v1456_v24 = vpop.permute.xlu1 %1455 }
0x256a   :  { %v1458_v28 = vmul.f32 %v1456_v24, %v1440_v10 }
0x256c   :  { %v1464_v31 = vpack.c.bf16 %v1458_v28, %v1458_v28 }
0x256e   :  { %1467 = vrot.lane.b32.xlu0 %v1464_v31, %s2047_s23 }
0x25e0   :  { %v1468_v15 = vpop.permute.xlu0 %1467 }
0x25e1   :  { %1917 = vmatmul.mubr.msk.bf16.vlgmr.msra.gmra.mxu1 %vm169_vm3, %v1468_v15 }
0x26a1   :  { %v1506_v34 = vpop.f32.mrf.mxu1 }
0x26a2   :  { %v1512_v41 = vadd.f32 %v1506_v34, %v900_v32 }
0x26a3   :  { %v1918_v35 = vpop.f32.mrf.mxu1 }
0x26a4   :  { %2038 = vtanh.f32 %v1512_v41  ;;  %v1513_v40 = vmul.f32 0.5, %v1512_v41 }
0x26a5   :  { %v1509_v36 = vpop.f32.mrf.mxu1 }
0x26a6   :  { %2040 = vtanh.f32 %v1513_v40 }
0x26a7   :  { %v1919_v30 = vpop.f32.mrf.mxu1 }
0x26b1   :  { %v2039_v37 = vpop.eup %2038 }
0x26b2   :  { %1520 = vrot.lane.b32.xlu1 %v2039_v37, %s2046_s7 }
0x26b3   :  { %v2041_v42 = vpop.eup %2040 }
0x26b4   :  { %v1515_v22 = vadd.f32 1.0, %v2041_v42 }
0x26b6   :  { %v1516_v43 = vmul.f32 0.5, %v1515_v22 }
0x26b8   :  { %v1518_v25 = vmul.f32 %v1516_v43, %v1452_v20 }
0x2724   :  { %v1521_v44 = vpop.permute.xlu1 %1520 }
0x2725   :  { %v1523_v45 = vmul.f32 %v1521_v44, %v1516_v43 }
0x2727   :  { %1525 = vrot.lane.b32.xlu0 %v1523_v45, %s2047_s23 }
0x272b   :  { %1004 = vrot.lane.b32.xlu0 %v2360_v51, %s2047_s23  ;;  %v1946_v51 = vld [vmem:[%s2556_s9 + $0x8] sm:$0xff]  }
0x272c   :  { %1920 = vmatprep.subr.bf16.mxu0 %v1946_v51 }
0x272d   :  { %1921 = vmatpush3.bf16.msra.mxu0 %v1946_v51 }
0x272e   :  { %1922 = vmatprep.subr.bf16.mxu0 %v1947_v52 }
0x272f   :  { %1156 = vrot.lane.b32.xlu0 %v2421_v60, %s2047_s23 }
0x2731   :  { %1923 = vmatpush3.bf16.msra.mxu0 %v1947_v52 }
0x2733   :  { %1308 = vrot.lane.b32.xlu0 %v2454_v46, %s2047_s23 }
0x2737   :  { %1460 = vrot.lane.b32.xlu0 %v1458_v28, %s2047_s23 }
0x2799   :  { %v1526_v38 = vpop.permute.xlu0 %1525 }
0x279a   :  { %v1528_v47 = vadd.f32 %v1526_v38, %v1518_v25 }
0x279c   :  { %2042 = vtanh.f32 %v1528_v47 }
0x279d   :  { %v1005_v48 = vpop.permute.xlu0 %1004 }
0x279e   :  { %1007 = vst.msk [vmem:[#allocation3] sm:$0xff] %vm169_vm3, %v1005_v48 }
0x27a1   :  { %v1157_v49 = vpop.permute.xlu0 %1156 }
0x27a2   :  { %1159 = vst.msk [vmem:[#allocation3 + $0x10] sm:$0xff] %vm169_vm3, %v1157_v49 }
0x27a5   :  { %v1309_v50 = vpop.permute.xlu0 %1308  ;;  %v1540_v23 = vld [vmem:[#allocation3] sm:$0xff] }
0x27a6   :  { %1311 = vst.msk [vmem:[#allocation3 + $0x20] sm:$0xff] %vm169_vm3, %v1309_v50 }
0x27a9   :  { %v2043_v60 = vpop.eup %2042  ;;  %v1461_v46 = vpop.permute.xlu0 %1460 }
0x27aa   :  { %1463 = vst.msk [vmem:[#allocation3 + $0x30] sm:$0xff] %vm169_vm3, %v1461_v46  ;;  %1531 = vrot.lane.b32.xlu1 %v2043_v60, %s2046_s7 }
0x27ad   :  { %v1544_v61 = vld [vmem:[#allocation3 + $0x20] sm:$0xff] }
0x27ae   :  { %1080 = vrot.lane.b32.xlu1 %v2390_v27, %s2047_s23 }
0x27b1   :  { %v1546_v53 = vld [vmem:[#allocation3 + $0x30] sm:$0xff] }
0x27b2   :  { %1232 = vrot.lane.b32.xlu1 %v2438_v17, %s2047_s23  ;;  %v1542_v17 = vld [vmem:[#allocation3 + $0x10] sm:$0xff] }
0x27b6   :  { %1384 = vrot.lane.b32.xlu1 %v2470_v0, %s2047_s23 }
0x281c   :  { %v1532_v54 = vpop.permute.xlu1 %1531 }
0x281d   :  { %v1534_v55 = vmul.f32 %v1532_v54, %v1516_v43 }
0x281f   :  { %1536 = vrot.lane.b32.xlu1 %v1534_v55, %s2047_s23 }
0x2820   :  { %v1081_v56 = vpop.permute.xlu1 %1080 }
0x2821   :  { %1083 = vst.msk [vmem:[#allocation3 + $0x8] sm:$0xff] %vm169_vm3, %v1081_v56 }
0x2824   :  { %v1233_v26 = vpop.permute.xlu1 %1232 }
0x2825   :  { %1235 = vst.msk [vmem:[#allocation3 + $0x18] sm:$0xff] %vm169_vm3, %v1233_v26 }
0x2828   :  { %v1385_v7 = vpop.permute.xlu1 %1384  ;;  %v1541_v57 = vld [vmem:[#allocation3 + $0x8] sm:$0xff] }
0x2829   :  { %1387 = vst.msk [vmem:[#allocation3 + $0x28] sm:$0xff] %vm169_vm3, %v1385_v7  ;;  %v1548_v27 = vpack.c.bf16 %v1541_v57, %v1540_v23 }
0x282b   :  { %1924 = vmatprep.mubr.msk.bf16.mxu0 %vm169_vm3, %v1548_v27 }
0x282c   :  { %v1543_v58 = vld [vmem:[#allocation3 + $0x18] sm:$0xff] }
0x282d   :  { %v1549_v14 = vpack.c.bf16 %v1543_v58, %v1542_v17 }
0x282f   :  { %1925 = vmatmul.mubr.msk.bf16.vlgmr.msra.gmra.mxu0 %vm169_vm3, %v1549_v14 }
0x2830   :  { %v1545_v8 = vld [vmem:[#allocation3 + $0x28] sm:$0xff] }
0x2831   :  { %v1550_v33 = vpack.c.bf16 %v1545_v8, %v1544_v61 }
0x2833   :  { %1928 = vmatprep.mubr.msk.bf16.mxu0 %vm169_vm3, %v1550_v33 }
0x2891   :  { %v1537_v29 = vpop.permute.xlu1 %1536 }
0x2892   :  { %1539 = vst.msk [vmem:[#allocation3 + $0x38] sm:$0xff] %vm169_vm3, %v1537_v29 }
0x2899   :  { %v1547_v39 = vld [vmem:[#allocation3 + $0x38] sm:$0xff] }
0x289a   :  { %v1551_v0 = vpack.c.bf16 %v1547_v39, %v1546_v53 }
0x289c   :  { %1929 = vmatmul.mubr.msk.bf16.gmra.mxu0 %vm169_vm3, %v1551_v0 }
0x28ef   :  { %v1926_v2 = vpop.f32.mrf.mxu0 }
0x28f0   :  { %v1630_v3 = vadd.f32 %v1926_v2, %v1698_v1 }
0x28f1   :  { %v1621_v4 = vpop.f32.mrf.mxu0 }
0x28f2   :  { %1654 = vst [vmem:[%s2558_s11 + $0x10] sm:$0xff] %v1630_v3  ;;  %v1622_v18 = vadd.f32 %v1698_v1, %v1621_v4 }
0x28f3   :  { %v1927_v11 = vpop.f32.mrf.mxu0 }
0x28f4   :  { %1652 = vst [vmem:[%s2558_s11] sm:$0xff] %v1622_v18  ;;  %v1633_v59 = vadd.f32 %v1927_v11, %v1698_v1 }
0x28f5   :  { %v1624_v63 = vpop.f32.mrf.mxu0 }
0x28f6   :  { %1655 = vst [vmem:[%s2558_s11 + $0x18] sm:$0xff] %v1633_v59  ;;  %v1625_v5 = vadd.f32 %v1698_v1, %v1624_v63 }
0x28f8   :  { %1653 = vst [vmem:[%s2558_s11 + $0x8] sm:$0xff] %v1625_v5 }
0x295c   :  { %v1930_v6 = vpop.f32.mrf.mxu0 }
0x295d   :  { %v1646_v9 = vadd.f32 %v1930_v6, %v1698_v1 }
0x295e   :  { %v1637_v62 = vpop.f32.mrf.mxu0 }
0x295f   :  { %1658 = vst [vmem:[%s2558_s11 + $0x30] sm:$0xff] %v1646_v9  ;;  %v1638_v10 = vadd.f32 %v1698_v1, %v1637_v62 }
0x2960   :  { %v1931_v12 = vpop.f32.mrf.mxu0 }
0x2961   :  { %1656 = vst [vmem:[%s2558_s11 + $0x20] sm:$0xff] %v1638_v10  ;;  %v1649_v13 = vadd.f32 %v1931_v12, %v1698_v1 }
0x2962   :  { %v1640_v19 = vpop.f32.mrf.mxu0 }
0x2963   :  { %1659 = vst [vmem:[%s2558_s11 + $0x38] sm:$0xff] %v1649_v13  ;;  %v1641_v16 = vadd.f32 %v1698_v1, %v1640_v19 }
0x2965   :  { %1657 = vst [vmem:[%s2558_s11 + $0x28] sm:$0xff] %v1641_v16 }

</bundles_post_ra>
